<compile_context>
chip_gen: v7x
topology: tpu7x:2x2x1
jax: 0.10.0
libtpu: 0.0.40
codegen_flags: <defaults>
</compile_context>

<pallas_src>
import jax
import jax.numpy as jnp
import numpy as np
from jax import lax
from jax.experimental import pallas as pl
from jax.experimental.pallas import tpu as pltpu

LANES = 128
SUBLANES = 8


def rnn_kernel(x_ref, wih_f_ref, whh_f_ref, gb_f_ref, bhn_f_ref,
               wih_b_ref, gb_b_ref, bhn_b_ref,
               fcw_f_ref, fcw_b_ref, fcb_ref,
               out_ref, h_scr, gi_scr):
    c = pl.program_id(1)
    nc = pl.num_programs(1)
    TC, BB, D = x_ref.shape
    H = bhn_f_ref.shape[1]
    wdtype = wih_f_ref.dtype

    # ---- forward hidden state lives in a VMEM scratch across time chunks.
    @pl.when(c == 0)
    def _():
        h_scr[...] = jnp.zeros_like(h_scr)

    # ---- input projection for the WHOLE chunk: one MXU matmul, biases folded.
    # gb_f = [b_ir+b_hr | b_iz+b_hz | b_in]; only b_hn stays inside r*(...).
    x = x_ref[...].reshape(TC * BB, D)
    gi = jnp.dot(x, wih_f_ref[...], preferred_element_type=jnp.float32) + gb_f_ref[...]
    gi_scr[...] = gi.reshape(TC, BB, 3 * H).astype(gi_scr.dtype)

    # Hoist loop invariants once (JAX does not CSE broadcast_in_dim in loops).
    whh = whh_f_ref[...]                                 # fused (H, 3H)
    bhn_f = jnp.broadcast_to(bhn_f_ref[...], (BB, H))

    def step(t, h):
        # ONE fused recurrent matmul per step; r/z/n slices are lane-aligned
        # when H is a multiple of 128 (module default H=128).
        gh = jnp.dot(h.astype(wdtype), whh, preferred_element_type=jnp.float32)
        g = gi_scr[t]                                    # leading-dim index: layout-free
        r = jax.nn.sigmoid(g[:, 0:H] + gh[:, 0:H])
        z = jax.nn.sigmoid(g[:, H:2 * H] + gh[:, H:2 * H])
        n = jnp.tanh(g[:, 2 * H:3 * H] + r * (gh[:, 2 * H:3 * H] + bhn_f))
        return n + z * (h - n)                           # == (1-z)*n + z*h

    h = lax.fori_loop(0, TC, step, h_scr[...], unroll=min(TC, 8))
    h_scr[...] = h

    # ---- last chunk: single reverse-GRU step (h0 = 0 => W_h*@h0 == 0),
    # fc (no concat: h_f@W_f + h_b@W_b + b) and sigmoid into a lane-dense slab.
    @pl.when(c == nc - 1)
    def _():
        x_last = x_ref[TC - 1]                           # (BB, D) = t = T-1
        gi_b = (jnp.dot(x_last, wih_b_ref[...], preferred_element_type=jnp.float32)
                + gb_b_ref[...])
        r_b = jax.nn.sigmoid(gi_b[:, 0:H])
        z_b = jax.nn.sigmoid(gi_b[:, H:2 * H])
        n_b = jnp.tanh(gi_b[:, 2 * H:3 * H] + r_b * bhn_b_ref[...])
        h_b = (1.0 - z_b) * n_b                          # + z_b * h0, h0 == 0
        logit = (jnp.dot(h.astype(wdtype), fcw_f_ref[...], preferred_element_type=jnp.float32)
                 + jnp.dot(h_b.astype(wdtype), fcw_b_ref[...], preferred_element_type=jnp.float32)
                 + fcb_ref[...])
        out_ref[...] = jax.nn.sigmoid(logit)


def rnn_forward(x_tokens, params, vocab_size, compute_dtype=jnp.float32,
                time_chunk=None):
    """Equivalent of RNN.forward: emb -> bi-GRU -> fc(last step) -> sigmoid."""
    B, T = x_tokens.shape
    D = params['emb'].shape[1]
    H = params['whh_f'].shape[0]

    # ---- launch geometry: batch padded to sublane multiple, batch-parallel
    # grid axis (megacore), sequential time-chunk axis.
    B_pad = -(-B // SUBLANES) * SUBLANES
    BB = B_pad if B_pad <= 128 else 128
    B_pad = -(-B_pad // BB) * BB
    nb = B_pad // BB
    if time_chunk is None:
        time_chunk = next(tc for tc in (8, 4, 2, 1) if T % tc == 0)
    assert T % time_chunk == 0, "time_chunk must divide T"
    TC = time_chunk
    nc = T // TC

    # ---- token ids -> time-major embedded activations (T, B_pad, D).
    # PyTorch: x.clamp(max=vocab_size); token ids assumed non-negative.
    idx = jnp.minimum(x_tokens, vocab_size)
    idx = jnp.pad(idx, ((0, B_pad - B), (0, 0)))
    # TODO(synk): move this gather into the kernel (scalar-prefetch the token
    # ids + per-chunk DMA gather) to avoid the extra HBM pass over (T,B,D).
    x3 = jnp.take(params['emb'], idx.T.reshape(-1), axis=0)
    x3 = x3.reshape(T, B_pad, D).astype(compute_dtype)

    # ---- one-time parameter re-layout: gate-aligned, bias-folded.
    cd = compute_dtype
    bih_f = params['bih_f'].reshape(1, 3 * H)
    bhh_f = params['bhh_f'].reshape(1, 3 * H)
    gb_f = jnp.concatenate([bih_f[:, :2 * H] + bhh_f[:, :2 * H], bih_f[:, 2 * H:]], axis=1)
    bhn_f = bhh_f[:, 2 * H:]
    bih_b = params['bih_b'].reshape(1, 3 * H)
    bhh_b = params['bhh_b'].reshape(1, 3 * H)
    gb_b = jnp.concatenate([bih_b[:, :2 * H] + bhh_b[:, :2 * H], bih_b[:, 2 * H:]], axis=1)
    bhn_b = bhh_b[:, 2 * H:]
    # fc weights zero-padded to lane-dense (.,128) slabs (column 0 = logit).
    fcw = params['fcw']
    fcw_f = jnp.zeros((H, LANES), jnp.float32).at[:, 0:1].set(fcw[:H])
    fcw_b = jnp.zeros((H, LANES), jnp.float32).at[:, 0:1].set(fcw[H:])
    fcb = jnp.zeros((1, LANES), jnp.float32).at[:, 0:1].set(params['fcb'])

    weights = (params['wih_f'].astype(cd),
               params['whh_f'].astype(cd),                 # fused (H, 3H)
               gb_f.astype(jnp.float32), bhn_f.astype(jnp.float32),
               params['wih_b'].astype(cd),
               gb_b.astype(jnp.float32), bhn_b.astype(jnp.float32),
               fcw_f.astype(cd), fcw_b.astype(cd), fcb)

    def full_spec(a):
        nd = a.ndim
        return pl.BlockSpec(a.shape, lambda b, c: (0,) * nd)

    in_specs = [pl.BlockSpec((TC, BB, D), lambda b, c: (c, b, 0))]
    in_specs += [full_spec(a) for a in weights]
    out_spec = pl.BlockSpec((BB, LANES), lambda b, c: (b, 0))

    # ---- VMEM budget sized from the actual resident footprint (+2x headroom
    # for double buffers), instead of relying on the scoped default.
    cbytes = jnp.dtype(cd).itemsize
    resident = (2 * sum(a.size * a.dtype.itemsize for a in weights)   # param tiles
                + 2 * TC * BB * D * cbytes                            # x chunk dbl-buf
                + 2 * BB * LANES * 4                                  # out dbl-buf
                + BB * H * 4                                          # h scratch
                + TC * BB * 3 * H * cbytes)                           # gi scratch
    vmem_limit = int(min(48 * 2 ** 20, max(8 * 2 ** 20, 2 * resident)))

    out = pl.pallas_call(
        rnn_kernel,
        out_shape=jax.ShapeDtypeStruct((B_pad, LANES), jnp.float32),
        grid_spec=pltpu.PrefetchScalarGridSpec(
            num_scalar_prefetch=0,
            grid=(nb, nc),
            in_specs=in_specs,
            out_specs=out_spec,
            scratch_shapes=[pltpu.VMEM((BB, H), jnp.float32),       # h carry
                            pltpu.VMEM((TC, BB, 3 * H), cd)],       # chunk gi
        ),
        compiler_params=pltpu.CompilerParams(
            dimension_semantics=("parallel", "arbitrary"),
            vmem_limit_bytes=vmem_limit),
    )(x3, *weights)
    return out[:B, 0:1]                                    # (B, 1)


def init_params(key, vocab_size, D, H):
    """Deterministic synthetic parameters matching nn.Embedding/GRU/Linear shapes."""
    ks = jax.random.split(key, 11)
    s_gru = 1.0 / np.sqrt(H)
    s_fc = 1.0 / np.sqrt(2 * H)

    def u(k, shape, scale):
        return jax.random.uniform(k, shape, jnp.float32, -scale, scale)

    return {
        'emb':   jax.random.normal(ks[0], (vocab_size + 1, D), jnp.float32),
        # GRU weights, already transposed for x @ W; gate order [r, z, n].
        'wih_f': u(ks[1], (D, 3 * H), s_gru),
        'whh_f': u(ks[2], (H, 3 * H), s_gru),
        'bih_f': u(ks[3], (1, 3 * H), s_gru),
        'bhh_f': u(ks[4], (1, 3 * H), s_gru),
        'wih_b': u(ks[5], (D, 3 * H), s_gru),
        'whh_b': u(ks[6], (H, 3 * H), s_gru),   # unused by the kernel (see note)
        'bih_b': u(ks[7], (1, 3 * H), s_gru),
        'bhh_b': u(ks[8], (1, 3 * H), s_gru),
        # fc: Linear(2H, 1) as (2H, 1) weight + (1, 1) bias.
        'fcw':   u(ks[9], (2 * H, 1), s_fc),
        'fcb':   u(ks[10], (1, 1), s_fc),
    }


def rnn_reference(x_tokens, params, vocab_size):
    """Pure-JAX reference (runs the FULL backward sweep, then takes t = T-1)."""
    idx = jnp.minimum(x_tokens, vocab_size)
    x_emb = jnp.take(params['emb'], idx, axis=0)
    B, T, _ = x_emb.shape
    H = params['whh_f'].shape[0]

    def step(h, x_t, wih, whh, bih, bhh):
        gi = x_t @ wih + bih
        gh = h @ whh + bhh
        r = jax.nn.sigmoid(gi[:, :H] + gh[:, :H])
        z = jax.nn.sigmoid(gi[:, H:2 * H] + gh[:, H:2 * H])
        n = jnp.tanh(gi[:, 2 * H:] + r * gh[:, 2 * H:])
        return (1 - z) * n + z * h

    h = jnp.zeros((B, H), jnp.float32)
    for t in range(T):
        h = step(h, x_emb[:, t], params['wih_f'], params['whh_f'],
                 params['bih_f'], params['bhh_f'])
    h_f_last = h

    h = jnp.zeros((B, H), jnp.float32)
    outs_b = [None] * T
    for t in range(T - 1, -1, -1):
        h = step(h, x_emb[:, t], params['wih_b'], params['whh_b'],
                 params['bih_b'], params['bhh_b'])
        outs_b[t] = h

    feat = jnp.concatenate([h_f_last, outs_b[-1]], axis=-1)
    return jax.nn.sigmoid(feat @ params['fcw'] + params['fcb'])


if __name__ == "__main__":
    # Module default hidden_size=128 (keeps the fused-gate slices lane-aligned).
    vocab_size, D, H, B, T = 50, 16, 128, 2, 8
    key = jax.random.PRNGKey(0)
    kx, kp = jax.random.split(key)
    # token ids intentionally exceed vocab_size sometimes to exercise clamp()
    x_tokens = jax.random.randint(kx, (B, T), 0, vocab_size + 5)
    params = init_params(kp, vocab_size, D, H)

    # time_chunk=4 -> 2 sequential time chunks, exercising the cross-chunk
    # hidden-state carry and the pipelined chunk DMA.
    out = jax.block_until_ready(rnn_forward(x_tokens, params, vocab_size, time_chunk=4))
    ref = rnn_reference(x_tokens, params, vocab_size)

    assert out.shape == (B, 1)
    np.testing.assert_allclose(np.asarray(out), np.asarray(ref), rtol=1e-4, atol=1e-4)
    print("KERNEL_OK")
</pallas_src>

<mosaic_0001>
module attributes {stable_mosaic.version = 11 : i64} {
  func.func @rnn_kernel(%arg0: i32, %arg1: i32, %arg2: memref<4x8x16xf32, #tpu.memory_space<vmem>>, %arg3: memref<16x384xf32, #tpu.memory_space<vmem>>, %arg4: memref<128x384xf32, #tpu.memory_space<vmem>>, %arg5: memref<1x384xf32, #tpu.memory_space<vmem>>, %arg6: memref<1x128xf32, #tpu.memory_space<vmem>>, %arg7: memref<16x384xf32, #tpu.memory_space<vmem>>, %arg8: memref<1x384xf32, #tpu.memory_space<vmem>>, %arg9: memref<1x128xf32, #tpu.memory_space<vmem>>, %arg10: memref<128x128xf32, #tpu.memory_space<vmem>>, %arg11: memref<128x128xf32, #tpu.memory_space<vmem>>, %arg12: memref<1x128xf32, #tpu.memory_space<vmem>>, %arg13: memref<8x128xf32, #tpu.memory_space<vmem>>, %arg14: memref<8x128xf32, #tpu.memory_space<vmem>>, %arg15: memref<4x8x384xf32, #tpu.memory_space<vmem>>) attributes {dimension_semantics = [#tpu.dimension_semantics<parallel>, #tpu.dimension_semantics<arbitrary>], iteration_bounds = array<i64: 1, 2>, scalar_prefetch = 0 : i64, scratch_operands = 2 : i64, tpu.core_type = #tpu.core_type<tc>, window_params = [{transform_indices = @transform_0, window_bounds = array<i64: 4, 8, 16>}, {pipeline_mode = #tpu.pipeline_mode<synchronous>, transform_indices = @transform_1, window_bounds = array<i64: 16, 384>}, {pipeline_mode = #tpu.pipeline_mode<synchronous>, transform_indices = @transform_2, window_bounds = array<i64: 128, 384>}, {pipeline_mode = #tpu.pipeline_mode<synchronous>, transform_indices = @transform_3, window_bounds = array<i64: 1, 384>}, {pipeline_mode = #tpu.pipeline_mode<synchronous>, transform_indices = @transform_4, window_bounds = array<i64: 1, 128>}, {pipeline_mode = #tpu.pipeline_mode<synchronous>, transform_indices = @transform_5, window_bounds = array<i64: 16, 384>}, {pipeline_mode = #tpu.pipeline_mode<synchronous>, transform_indices = @transform_6, window_bounds = array<i64: 1, 384>}, {pipeline_mode = #tpu.pipeline_mode<synchronous>, transform_indices = @transform_7, window_bounds = array<i64: 1, 128>}, {pipeline_mode = #tpu.pipeline_mode<synchronous>, transform_indices = @transform_8, window_bounds = array<i64: 128, 128>}, {pipeline_mode = #tpu.pipeline_mode<synchronous>, transform_indices = @transform_9, window_bounds = array<i64: 128, 128>}, {pipeline_mode = #tpu.pipeline_mode<synchronous>, transform_indices = @transform_10, window_bounds = array<i64: 1, 128>}, {transform_indices = @transform_11, window_bounds = array<i64: 8, 128>}]} {
    %c0_i32 = arith.constant 0 : i32
    %0 = arith.cmpi eq, %arg1, %c0_i32 : i32
    %1 = arith.extui %0 : i1 to i32
    %c0_i32_0 = arith.constant 0 : i32
    %2 = arith.cmpi ne, %1, %c0_i32_0 : i32
    scf.if %2 {
      %cst_41 = arith.constant 0.000000e+00 : f32
      %137 = vector.broadcast %cst_41 : f32 to vector<8x128xf32>
      %c0_42 = arith.constant 0 : index
      %c0_43 = arith.constant 0 : index
      %138 = vector.load %arg14[%c0_42, %c0_43] : memref<8x128xf32, #tpu.memory_space<vmem>>, vector<8x128xf32>
      tpu.vector_store %arg14[%c0_42, %c0_43], %137 {strides = array<i32>} : memref<8x128xf32, #tpu.memory_space<vmem>>, vector<8x128xf32>,
    } else {
    }
    %c0 = arith.constant 0 : index
    %c0_1 = arith.constant 0 : index
    %c0_2 = arith.constant 0 : index
    %3 = vector.load %arg2[%c0, %c0_1, %c0_2] : memref<4x8x16xf32, #tpu.memory_space<vmem>>, vector<4x8x16xf32>
    %4 = vector.shape_cast %3 : vector<4x8x16xf32> to vector<32x16xf32>
    %c0_3 = arith.constant 0 : index
    %c0_4 = arith.constant 0 : index
    %5 = vector.load %arg3[%c0_3, %c0_4] : memref<16x384xf32, #tpu.memory_space<vmem>>, vector<16x384xf32>
    %cst = arith.constant dense<0.000000e+00> : vector<32x384xf32>
    %6 = tpu.matmul %4, %5, %cst {dimension_numbers = #tpu.dot_dimension_numbers<[1], [0], [0], [1], [0, 0, 1, 1], [], []>} : vector<32x16xf32>, vector<16x384xf32>, vector<32x384xf32> -> vector<32x384xf32>
    %c0_5 = arith.constant 0 : index
    %c0_6 = arith.constant 0 : index
    %7 = vector.load %arg5[%c0_5, %c0_6] : memref<1x384xf32, #tpu.memory_space<vmem>>, vector<1x384xf32>
    %8 = vector.broadcast %7 : vector<1x384xf32> to vector<32x384xf32>
    %9 = arith.addf %6, %8 : vector<32x384xf32>
    %10 = vector.shape_cast %9 : vector<32x384xf32> to vector<4x8x384xf32>
    %c0_7 = arith.constant 0 : index
    %c0_8 = arith.constant 0 : index
    %c0_9 = arith.constant 0 : index
    %11 = vector.load %arg15[%c0_7, %c0_8, %c0_9] : memref<4x8x384xf32, #tpu.memory_space<vmem>>, vector<4x8x384xf32>
    tpu.vector_store %arg15[%c0_7, %c0_8, %c0_9], %10 {strides = array<i32>} : memref<4x8x384xf32, #tpu.memory_space<vmem>>, vector<4x8x384xf32>,
    %c0_10 = arith.constant 0 : index
    %c0_11 = arith.constant 0 : index
    %12 = vector.load %arg4[%c0_10, %c0_11] : memref<128x384xf32, #tpu.memory_space<vmem>>, vector<128x384xf32>
    %c0_12 = arith.constant 0 : index
    %c0_13 = arith.constant 0 : index
    %13 = vector.load %arg6[%c0_12, %c0_13] : memref<1x128xf32, #tpu.memory_space<vmem>>, vector<1x128xf32>
    %14 = vector.shape_cast %13 : vector<1x128xf32> to vector<1x128xf32>
    %15 = vector.broadcast %14 : vector<1x128xf32> to vector<8x128xf32>
    %c0_14 = arith.constant 0 : index
    %c0_15 = arith.constant 0 : index
    %16 = vector.load %arg14[%c0_14, %c0_15] : memref<8x128xf32, #tpu.memory_space<vmem>>, vector<8x128xf32>
    %c0_i32_16 = arith.constant 0 : i32
    %cst_17 = arith.constant dense<0.000000e+00> : vector<8x384xf32>
    %17 = tpu.matmul %16, %12, %cst_17 {dimension_numbers = #tpu.dot_dimension_numbers<[1], [0], [0], [1], [0, 0, 1, 1], [], []>} : vector<8x128xf32>, vector<128x384xf32>, vector<8x384xf32> -> vector<8x384xf32>
    %18 = arith.index_cast %c0_i32_16 : i32 to index
    %c0_18 = arith.constant 0 : index
    %c0_19 = arith.constant 0 : index
    %19 = vector.load %arg15[%18, %c0_18, %c0_19] : memref<4x8x384xf32, #tpu.memory_space<vmem>>, vector<1x8x384xf32>
    %20 = vector.shape_cast %19 : vector<1x8x384xf32> to vector<8x384xf32>
    %21 = vector.extract_strided_slice %20 {offsets = [0, 0], sizes = [8, 128], strides = [1, 1]} : vector<8x384xf32> to vector<8x128xf32>
    %22 = vector.extract_strided_slice %17 {offsets = [0, 0], sizes = [8, 128], strides = [1, 1]} : vector<8x384xf32> to vector<8x128xf32>
    %23 = arith.addf %21, %22 : vector<8x128xf32>
    %24 = arith.negf %23 : vector<8x128xf32>
    %25 = math.exp %24 : vector<8x128xf32>
    %cst_20 = arith.constant 1.000000e+00 : f32
    %26 = vector.broadcast %cst_20 : f32 to vector<8x128xf32>
    %27 = arith.addf %26, %25 : vector<8x128xf32>
    %28 = arith.divf %26, %27 : vector<8x128xf32>
    %29 = vector.extract_strided_slice %20 {offsets = [0, 128], sizes = [8, 128], strides = [1, 1]} : vector<8x384xf32> to vector<8x128xf32>
    %30 = vector.extract_strided_slice %17 {offsets = [0, 128], sizes = [8, 128], strides = [1, 1]} : vector<8x384xf32> to vector<8x128xf32>
    %31 = arith.addf %29, %30 : vector<8x128xf32>
    %32 = arith.negf %31 : vector<8x128xf32>
    %33 = math.exp %32 : vector<8x128xf32>
    %cst_21 = arith.constant 1.000000e+00 : f32
    %34 = vector.broadcast %cst_21 : f32 to vector<8x128xf32>
    %35 = arith.addf %34, %33 : vector<8x128xf32>
    %36 = arith.divf %34, %35 : vector<8x128xf32>
    %37 = vector.extract_strided_slice %20 {offsets = [0, 256], sizes = [8, 128], strides = [1, 1]} : vector<8x384xf32> to vector<8x128xf32>
    %38 = vector.extract_strided_slice %17 {offsets = [0, 256], sizes = [8, 128], strides = [1, 1]} : vector<8x384xf32> to vector<8x128xf32>
    %39 = arith.addf %38, %15 : vector<8x128xf32>
    %40 = arith.mulf %28, %39 : vector<8x128xf32>
    %41 = arith.addf %37, %40 : vector<8x128xf32>
    %42 = math.tanh %41 : vector<8x128xf32>
    %43 = arith.subf %16, %42 : vector<8x128xf32>
    %44 = arith.mulf %36, %43 : vector<8x128xf32>
    %45 = arith.addf %42, %44 : vector<8x128xf32>
    %c1_i32 = arith.constant 1 : i32
    %cst_22 = arith.constant dense<0.000000e+00> : vector<8x384xf32>
    %46 = tpu.matmul %45, %12, %cst_22 {dimension_numbers = #tpu.dot_dimension_numbers<[1], [0], [0], [1], [0, 0, 1, 1], [], []>} : vector<8x128xf32>, vector<128x384xf32>, vector<8x384xf32> -> vector<8x384xf32>
    %47 = arith.index_cast %c1_i32 : i32 to index
    %c0_23 = arith.constant 0 : index
    %c0_24 = arith.constant 0 : index
    %48 = vector.load %arg15[%47, %c0_23, %c0_24] : memref<4x8x384xf32, #tpu.memory_space<vmem>>, vector<1x8x384xf32>
    %49 = vector.shape_cast %48 : vector<1x8x384xf32> to vector<8x384xf32>
    %50 = vector.extract_strided_slice %49 {offsets = [0, 0], sizes = [8, 128], strides = [1, 1]} : vector<8x384xf32> to vector<8x128xf32>
    %51 = vector.extract_strided_slice %46 {offsets = [0, 0], sizes = [8, 128], strides = [1, 1]} : vector<8x384xf32> to vector<8x128xf32>
    %52 = arith.addf %50, %51 : vector<8x128xf32>
    %53 = arith.negf %52 : vector<8x128xf32>
    %54 = math.exp %53 : vector<8x128xf32>
    %cst_25 = arith.constant 1.000000e+00 : f32
    %55 = vector.broadcast %cst_25 : f32 to vector<8x128xf32>
    %56 = arith.addf %55, %54 : vector<8x128xf32>
    %57 = arith.divf %55, %56 : vector<8x128xf32>
    %58 = vector.extract_strided_slice %49 {offsets = [0, 128], sizes = [8, 128], strides = [1, 1]} : vector<8x384xf32> to vector<8x128xf32>
    %59 = vector.extract_strided_slice %46 {offsets = [0, 128], sizes = [8, 128], strides = [1, 1]} : vector<8x384xf32> to vector<8x128xf32>
    %60 = arith.addf %58, %59 : vector<8x128xf32>
    %61 = arith.negf %60 : vector<8x128xf32>
    %62 = math.exp %61 : vector<8x128xf32>
    %cst_26 = arith.constant 1.000000e+00 : f32
    %63 = vector.broadcast %cst_26 : f32 to vector<8x128xf32>
    %64 = arith.addf %63, %62 : vector<8x128xf32>
    %65 = arith.divf %63, %64 : vector<8x128xf32>
    %66 = vector.extract_strided_slice %49 {offsets = [0, 256], sizes = [8, 128], strides = [1, 1]} : vector<8x384xf32> to vector<8x128xf32>
    %67 = vector.extract_strided_slice %46 {offsets = [0, 256], sizes = [8, 128], strides = [1, 1]} : vector<8x384xf32> to vector<8x128xf32>
    %68 = arith.addf %67, %15 : vector<8x128xf32>
    %69 = arith.mulf %57, %68 : vector<8x128xf32>
    %70 = arith.addf %66, %69 : vector<8x128xf32>
    %71 = math.tanh %70 : vector<8x128xf32>
    %72 = arith.subf %45, %71 : vector<8x128xf32>
    %73 = arith.mulf %65, %72 : vector<8x128xf32>
    %74 = arith.addf %71, %73 : vector<8x128xf32>
    %c2_i32 = arith.constant 2 : i32
    %cst_27 = arith.constant dense<0.000000e+00> : vector<8x384xf32>
    %75 = tpu.matmul %74, %12, %cst_27 {dimension_numbers = #tpu.dot_dimension_numbers<[1], [0], [0], [1], [0, 0, 1, 1], [], []>} : vector<8x128xf32>, vector<128x384xf32>, vector<8x384xf32> -> vector<8x384xf32>
    %76 = arith.index_cast %c2_i32 : i32 to index
    %c0_28 = arith.constant 0 : index
    %c0_29 = arith.constant 0 : index
    %77 = vector.load %arg15[%76, %c0_28, %c0_29] : memref<4x8x384xf32, #tpu.memory_space<vmem>>, vector<1x8x384xf32>
    %78 = vector.shape_cast %77 : vector<1x8x384xf32> to vector<8x384xf32>
    %79 = vector.extract_strided_slice %78 {offsets = [0, 0], sizes = [8, 128], strides = [1, 1]} : vector<8x384xf32> to vector<8x128xf32>
    %80 = vector.extract_strided_slice %75 {offsets = [0, 0], sizes = [8, 128], strides = [1, 1]} : vector<8x384xf32> to vector<8x128xf32>
    %81 = arith.addf %79, %80 : vector<8x128xf32>
    %82 = arith.negf %81 : vector<8x128xf32>
    %83 = math.exp %82 : vector<8x128xf32>
    %cst_30 = arith.constant 1.000000e+00 : f32
    %84 = vector.broadcast %cst_30 : f32 to vector<8x128xf32>
    %85 = arith.addf %84, %83 : vector<8x128xf32>
    %86 = arith.divf %84, %85 : vector<8x128xf32>
    %87 = vector.extract_strided_slice %78 {offsets = [0, 128], sizes = [8, 128], strides = [1, 1]} : vector<8x384xf32> to vector<8x128xf32>
    %88 = vector.extract_strided_slice %75 {offsets = [0, 128], sizes = [8, 128], strides = [1, 1]} : vector<8x384xf32> to vector<8x128xf32>
    %89 = arith.addf %87, %88 : vector<8x128xf32>
    %90 = arith.negf %89 : vector<8x128xf32>
    %91 = math.exp %90 : vector<8x128xf32>
    %cst_31 = arith.constant 1.000000e+00 : f32
    %92 = vector.broadcast %cst_31 : f32 to vector<8x128xf32>
    %93 = arith.addf %92, %91 : vector<8x128xf32>
    %94 = arith.divf %92, %93 : vector<8x128xf32>
    %95 = vector.extract_strided_slice %78 {offsets = [0, 256], sizes = [8, 128], strides = [1, 1]} : vector<8x384xf32> to vector<8x128xf32>
    %96 = vector.extract_strided_slice %75 {offsets = [0, 256], sizes = [8, 128], strides = [1, 1]} : vector<8x384xf32> to vector<8x128xf32>
    %97 = arith.addf %96, %15 : vector<8x128xf32>
    %98 = arith.mulf %86, %97 : vector<8x128xf32>
    %99 = arith.addf %95, %98 : vector<8x128xf32>
    %100 = math.tanh %99 : vector<8x128xf32>
    %101 = arith.subf %74, %100 : vector<8x128xf32>
    %102 = arith.mulf %94, %101 : vector<8x128xf32>
    %103 = arith.addf %100, %102 : vector<8x128xf32>
    %c3_i32 = arith.constant 3 : i32
    %cst_32 = arith.constant dense<0.000000e+00> : vector<8x384xf32>
    %104 = tpu.matmul %103, %12, %cst_32 {dimension_numbers = #tpu.dot_dimension_numbers<[1], [0], [0], [1], [0, 0, 1, 1], [], []>} : vector<8x128xf32>, vector<128x384xf32>, vector<8x384xf32> -> vector<8x384xf32>
    %105 = arith.index_cast %c3_i32 : i32 to index
    %c0_33 = arith.constant 0 : index
    %c0_34 = arith.constant 0 : index
    %106 = vector.load %arg15[%105, %c0_33, %c0_34] : memref<4x8x384xf32, #tpu.memory_space<vmem>>, vector<1x8x384xf32>
    %107 = vector.shape_cast %106 : vector<1x8x384xf32> to vector<8x384xf32>
    %108 = vector.extract_strided_slice %107 {offsets = [0, 0], sizes = [8, 128], strides = [1, 1]} : vector<8x384xf32> to vector<8x128xf32>
    %109 = vector.extract_strided_slice %104 {offsets = [0, 0], sizes = [8, 128], strides = [1, 1]} : vector<8x384xf32> to vector<8x128xf32>
    %110 = arith.addf %108, %109 : vector<8x128xf32>
    %111 = arith.negf %110 : vector<8x128xf32>
    %112 = math.exp %111 : vector<8x128xf32>
    %cst_35 = arith.constant 1.000000e+00 : f32
    %113 = vector.broadcast %cst_35 : f32 to vector<8x128xf32>
    %114 = arith.addf %113, %112 : vector<8x128xf32>
    %115 = arith.divf %113, %114 : vector<8x128xf32>
    %116 = vector.extract_strided_slice %107 {offsets = [0, 128], sizes = [8, 128], strides = [1, 1]} : vector<8x384xf32> to vector<8x128xf32>
    %117 = vector.extract_strided_slice %104 {offsets = [0, 128], sizes = [8, 128], strides = [1, 1]} : vector<8x384xf32> to vector<8x128xf32>
    %118 = arith.addf %116, %117 : vector<8x128xf32>
    %119 = arith.negf %118 : vector<8x128xf32>
    %120 = math.exp %119 : vector<8x128xf32>
    %cst_36 = arith.constant 1.000000e+00 : f32
    %121 = vector.broadcast %cst_36 : f32 to vector<8x128xf32>
    %122 = arith.addf %121, %120 : vector<8x128xf32>
    %123 = arith.divf %121, %122 : vector<8x128xf32>
    %124 = vector.extract_strided_slice %107 {offsets = [0, 256], sizes = [8, 128], strides = [1, 1]} : vector<8x384xf32> to vector<8x128xf32>
    %125 = vector.extract_strided_slice %104 {offsets = [0, 256], sizes = [8, 128], strides = [1, 1]} : vector<8x384xf32> to vector<8x128xf32>
    %126 = arith.addf %125, %15 : vector<8x128xf32>
    %127 = arith.mulf %115, %126 : vector<8x128xf32>
    %128 = arith.addf %124, %127 : vector<8x128xf32>
    %129 = math.tanh %128 : vector<8x128xf32>
    %130 = arith.subf %103, %129 : vector<8x128xf32>
    %131 = arith.mulf %123, %130 : vector<8x128xf32>
    %132 = arith.addf %129, %131 : vector<8x128xf32>
    %c4_i32 = arith.constant 4 : i32
    %c0_37 = arith.constant 0 : index
    %c0_38 = arith.constant 0 : index
    %133 = vector.load %arg14[%c0_37, %c0_38] : memref<8x128xf32, #tpu.memory_space<vmem>>, vector<8x128xf32>
    tpu.vector_store %arg14[%c0_37, %c0_38], %132 {strides = array<i32>} : memref<8x128xf32, #tpu.memory_space<vmem>>, vector<8x128xf32>,
    %c1_i32_39 = arith.constant 1 : i32
    %134 = arith.cmpi eq, %arg1, %c1_i32_39 : i32
    %135 = arith.extui %134 : i1 to i32
    %c0_i32_40 = arith.constant 0 : i32
    %136 = arith.cmpi ne, %135, %c0_i32_40 : i32
    scf.if %136 {
      %c3 = arith.constant 3 : index
      %c0_41 = arith.constant 0 : index
      %c0_42 = arith.constant 0 : index
      %137 = vector.load %arg2[%c3, %c0_41, %c0_42] : memref<4x8x16xf32, #tpu.memory_space<vmem>>, vector<1x8x16xf32>
      %138 = vector.shape_cast %137 : vector<1x8x16xf32> to vector<8x16xf32>
      %c0_43 = arith.constant 0 : index
      %c0_44 = arith.constant 0 : index
      %139 = vector.load %arg7[%c0_43, %c0_44] : memref<16x384xf32, #tpu.memory_space<vmem>>, vector<16x384xf32>
      %cst_45 = arith.constant dense<0.000000e+00> : vector<8x384xf32>
      %140 = tpu.matmul %138, %139, %cst_45 {dimension_numbers = #tpu.dot_dimension_numbers<[1], [0], [0], [1], [0, 0, 1, 1], [], []>} : vector<8x16xf32>, vector<16x384xf32>, vector<8x384xf32> -> vector<8x384xf32>
      %c0_46 = arith.constant 0 : index
      %c0_47 = arith.constant 0 : index
      %141 = vector.load %arg8[%c0_46, %c0_47] : memref<1x384xf32, #tpu.memory_space<vmem>>, vector<1x384xf32>
      %142 = vector.broadcast %141 : vector<1x384xf32> to vector<8x384xf32>
      %143 = arith.addf %140, %142 : vector<8x384xf32>
      %144 = vector.extract_strided_slice %143 {offsets = [0, 0], sizes = [8, 128], strides = [1, 1]} : vector<8x384xf32> to vector<8x128xf32>
      %145 = arith.negf %144 : vector<8x128xf32>
      %146 = math.exp %145 : vector<8x128xf32>
      %cst_48 = arith.constant 1.000000e+00 : f32
      %147 = vector.broadcast %cst_48 : f32 to vector<8x128xf32>
      %148 = arith.addf %147, %146 : vector<8x128xf32>
      %149 = arith.divf %147, %148 : vector<8x128xf32>
      %150 = vector.extract_strided_slice %143 {offsets = [0, 128], sizes = [8, 128], strides = [1, 1]} : vector<8x384xf32> to vector<8x128xf32>
      %151 = arith.negf %150 : vector<8x128xf32>
      %152 = math.exp %151 : vector<8x128xf32>
      %cst_49 = arith.constant 1.000000e+00 : f32
      %153 = vector.broadcast %cst_49 : f32 to vector<8x128xf32>
      %154 = arith.addf %153, %152 : vector<8x128xf32>
      %155 = arith.divf %153, %154 : vector<8x128xf32>
      %156 = vector.extract_strided_slice %143 {offsets = [0, 256], sizes = [8, 128], strides = [1, 1]} : vector<8x384xf32> to vector<8x128xf32>
      %c0_50 = arith.constant 0 : index
      %c0_51 = arith.constant 0 : index
      %157 = vector.load %arg9[%c0_50, %c0_51] : memref<1x128xf32, #tpu.memory_space<vmem>>, vector<1x128xf32>
      %158 = vector.broadcast %157 : vector<1x128xf32> to vector<8x128xf32>
      %159 = arith.mulf %149, %158 : vector<8x128xf32>
      %160 = arith.addf %156, %159 : vector<8x128xf32>
      %161 = math.tanh %160 : vector<8x128xf32>
      %cst_52 = arith.constant 1.000000e+00 : f32
      %162 = vector.broadcast %cst_52 : f32 to vector<8x128xf32>
      %163 = arith.subf %162, %155 : vector<8x128xf32>
      %164 = arith.mulf %163, %161 : vector<8x128xf32>
      %c0_53 = arith.constant 0 : index
      %c0_54 = arith.constant 0 : index
      %165 = vector.load %arg10[%c0_53, %c0_54] : memref<128x128xf32, #tpu.memory_space<vmem>>, vector<128x128xf32>
      %cst_55 = arith.constant dense<0.000000e+00> : vector<8x128xf32>
      %166 = tpu.matmul %132, %165, %cst_55 {dimension_numbers = #tpu.dot_dimension_numbers<[1], [0], [0], [1], [0, 0, 1, 1], [], []>} : vector<8x128xf32>, vector<128x128xf32>, vector<8x128xf32> -> vector<8x128xf32>
      %c0_56 = arith.constant 0 : index
      %c0_57 = arith.constant 0 : index
      %167 = vector.load %arg11[%c0_56, %c0_57] : memref<128x128xf32, #tpu.memory_space<vmem>>, vector<128x128xf32>
      %cst_58 = arith.constant dense<0.000000e+00> : vector<8x128xf32>
      %168 = tpu.matmul %164, %167, %cst_58 {dimension_numbers = #tpu.dot_dimension_numbers<[1], [0], [0], [1], [0, 0, 1, 1], [], []>} : vector<8x128xf32>, vector<128x128xf32>, vector<8x128xf32> -> vector<8x128xf32>
      %169 = arith.addf %166, %168 : vector<8x128xf32>
      %c0_59 = arith.constant 0 : index
      %c0_60 = arith.constant 0 : index
      %170 = vector.load %arg12[%c0_59, %c0_60] : memref<1x128xf32, #tpu.memory_space<vmem>>, vector<1x128xf32>
      %171 = vector.broadcast %170 : vector<1x128xf32> to vector<8x128xf32>
      %172 = arith.addf %169, %171 : vector<8x128xf32>
      %173 = arith.negf %172 : vector<8x128xf32>
      %174 = math.exp %173 : vector<8x128xf32>
      %cst_61 = arith.constant 1.000000e+00 : f32
      %175 = vector.broadcast %cst_61 : f32 to vector<8x128xf32>
      %176 = arith.addf %175, %174 : vector<8x128xf32>
      %177 = arith.divf %175, %176 : vector<8x128xf32>
      %c0_62 = arith.constant 0 : index
      %c0_63 = arith.constant 0 : index
      %178 = vector.load %arg13[%c0_62, %c0_63] : memref<8x128xf32, #tpu.memory_space<vmem>>, vector<8x128xf32>
      tpu.vector_store %arg13[%c0_62, %c0_63], %177 {strides = array<i32>} : memref<8x128xf32, #tpu.memory_space<vmem>>, vector<8x128xf32>,
    } else {
    }
    return
  }
  func.func @transform_0(%arg0: i32, %arg1: i32) -> (i32, i32, i32) {
    %c0_i32 = arith.constant 0 : i32
    %c0_i32_0 = arith.constant 0 : i32
    return %arg1, %arg0, %c0_i32 : i32, i32, i32
  }
  func.func @transform_1(%arg0: i32, %arg1: i32) -> (i32, i32) {
    %c0_i32 = arith.constant 0 : i32
    %c0_i32_0 = arith.constant 0 : i32
    %c0_i32_1 = arith.constant 0 : i32
    return %c0_i32, %c0_i32_0 : i32, i32
  }
  func.func @transform_2(%arg0: i32, %arg1: i32) -> (i32, i32) {
    %c0_i32 = arith.constant 0 : i32
    %c0_i32_0 = arith.constant 0 : i32
    %c0_i32_1 = arith.constant 0 : i32
    return %c0_i32, %c0_i32_0 : i32, i32
  }
  func.func @transform_3(%arg0: i32, %arg1: i32) -> (i32, i32) {
    %c0_i32 = arith.constant 0 : i32
    %c0_i32_0 = arith.constant 0 : i32
    %c0_i32_1 = arith.constant 0 : i32
    return %c0_i32, %c0_i32_0 : i32, i32
  }
  func.func @transform_4(%arg0: i32, %arg1: i32) -> (i32, i32) {
    %c0_i32 = arith.constant 0 : i32
    %c0_i32_0 = arith.constant 0 : i32
    %c0_i32_1 = arith.constant 0 : i32
    return %c0_i32, %c0_i32_0 : i32, i32
  }
  func.func @transform_5(%arg0: i32, %arg1: i32) -> (i32, i32) {
    %c0_i32 = arith.constant 0 : i32
    %c0_i32_0 = arith.constant 0 : i32
    %c0_i32_1 = arith.constant 0 : i32
    return %c0_i32, %c0_i32_0 : i32, i32
  }
  func.func @transform_6(%arg0: i32, %arg1: i32) -> (i32, i32) {
    %c0_i32 = arith.constant 0 : i32
    %c0_i32_0 = arith.constant 0 : i32
    %c0_i32_1 = arith.constant 0 : i32
    return %c0_i32, %c0_i32_0 : i32, i32
  }
  func.func @transform_7(%arg0: i32, %arg1: i32) -> (i32, i32) {
    %c0_i32 = arith.constant 0 : i32
    %c0_i32_0 = arith.constant 0 : i32
    %c0_i32_1 = arith.constant 0 : i32
    return %c0_i32, %c0_i32_0 : i32, i32
  }
  func.func @transform_8(%arg0: i32, %arg1: i32) -> (i32, i32) {
    %c0_i32 = arith.constant 0 : i32
    %c0_i32_0 = arith.constant 0 : i32
    %c0_i32_1 = arith.constant 0 : i32
    return %c0_i32, %c0_i32_0 : i32, i32
  }
  func.func @transform_9(%arg0: i32, %arg1: i32) -> (i32, i32) {
    %c0_i32 = arith.constant 0 : i32
    %c0_i32_0 = arith.constant 0 : i32
    %c0_i32_1 = arith.constant 0 : i32
    return %c0_i32, %c0_i32_0 : i32, i32
  }
  func.func @transform_10(%arg0: i32, %arg1: i32) -> (i32, i32) {
    %c0_i32 = arith.constant 0 : i32
    %c0_i32_0 = arith.constant 0 : i32
    %c0_i32_1 = arith.constant 0 : i32
    return %c0_i32, %c0_i32_0 : i32, i32
  }
  func.func @transform_11(%arg0: i32, %arg1: i32) -> (i32, i32) {
    %c0_i32 = arith.constant 0 : i32
    %c0_i32_0 = arith.constant 0 : i32
    return %arg0, %c0_i32 : i32, i32
  }
}

</mosaic_0001>

<bundles_post_ra>
// kernel: tpu_custom_call.1
= control target key start
LH: loop header
LB: loop body
LE: loop exit
PB: predicated region body
PF: predicated region fallthrough
CT: control target
= control target key end

     0   :  { %s3764_s0 = inlined_call_operand.hbm [shape: f32[8,8,16], index: 0, kind: input, shape index: {}]   ;;  %s3765_s1 = inlined_call_operand.hbm [shape: f32[16,384], index: 1, kind: input, shape index: {}]   ;;  %s3766_s2 = inlined_call_operand.hbm [shape: f32[128,384], index: 2, kind: input, shape index: {}]   ;;  %s3767_s3 = inlined_call_operand.vmem [shape: f32[1,384], index: 3, kind: input, shape index: {}]   ;;  %s3768_s4 = inlined_call_operand.vmem [shape: f32[1,128], index: 4, kind: input, shape index: {}]   ;;  %s3769_s5 = inlined_call_operand.hbm [shape: f32[16,384], index: 5, kind: input, shape index: {}]   ;;  %s3770_s6 = inlined_call_operand.vmem [shape: f32[1,384], index: 6, kind: input, shape index: {}]   ;;  %s3771_s7 = inlined_call_operand.vmem [shape: f32[1,128], index: 7, kind: input, shape index: {}]   ;;  %s3772_s8 = inlined_call_operand.hbm [shape: f32[128,128], index: 8, kind: input, shape index: {}]   ;;  %s3773_s9 = inlined_call_operand.hbm [shape: f32[128,128], index: 9, kind: input, shape index: {}]   ;;  %s3774_s10 = inlined_call_operand.vmem [shape: f32[1,128], index: 10, kind: input, shape index: {}]   ;;  %s3775_s11 = inlined_call_operand.hbm [shape: f32[8,128], index: 11, kind: output, shape index: {}]  }
   0x1   :  { %3781 = sst [smem:[#allocation21_spill]] %s3768_s4 }
   0x2   :  { %3782 = sst [smem:[#allocation22_spill]] %s3770_s6 }
   0x3   :  { %3783 = sst [smem:[#allocation23_spill]] %s3771_s7 }
   0x4   :  { %3784 = sst [smem:[#allocation24_spill]] %s3774_s10 }
   0x5   :  { %3785 = sst [smem:[#allocation25_spill]] %s3775_s11 }
   0x6   :  { %16 = vsyncpa [#allocation5], 0 }
   0x7   :  { %18 = vsyncpa [#allocation5 + $0x1], 0 }
   0x8   :  { %19 = vsyncpa [#allocation8], 0 }
   0x9   :  { %20 = vsyncpa [#allocation11], 0 }
   0xa   :  { %21 = vsyncpa [#allocation14], 0 }
   0xb   :  { %22 = vsyncpa [#allocation6], 0  ;;  %s3153_s17 = smov 0   ;;  %s3155_s18 = smov 0  }
   0xc   :  { %s3157_s19 = smov 0   ;;  %s3159_s20 = smov 0  }
   0xd   :  { %s3161_s21 = smov 0   ;;  %s3163_s22 = smov 0  }
   0xe LB: > { %s3776_s23 = sadd.s32 4294967295, %s3073_s22   ;;  %p1943_p0 = scmp.ge.s32.totalorder %s3073_s22, 1  ;;  %s3073_s22 = sphi %s3163_s22, %s28_s22   ;;  %s3069_s21 = sphi %s3161_s21, %s3807_s21   ;;  %s3065_s20 = sphi %s3159_s20, %s3806_s20   ;;  %s3061_s19 = sphi %s3157_s19, %s3805_s19   ;;  %s3057_s18 = sphi %s3155_s18, %s3804_s18   ;;  %s3053_s17 = sphi %s3153_s17, %s3803_s17  }
   0xf   : > { %p3187_p1 = scmp.eq.s32.totalorder %s3776_s23, 0  ;;  %p309_p2 = scmp.lt.s32.totalorder %s3073_s22, 3 }
  0x10   : > { %s3075_s26 = smov [#allocation7]   ;;  %s3076_s29 = smov [#allocation10]  }
  0x11   : > { %s3786_s24 = scalar_select %p3187_p1, 1, 0 }
  0x12   : > { %p3192_p3 = pnand %p1943_p0, %p309_p2  ;;  %s321_s27 = sshll.u32 %s3075_s26, 4  ;;  %s3196_s27 = int_to_ptr.vmem [resolvable:$true] %s321_s27 }
  0x13   : > { %s353_s30 = sshll.u32 %s3076_s29, 4  ;;  %s3077_s12 = smov [#allocation9]   ;;  %s3206_s30 = int_to_ptr.vmem [resolvable:$true] %s353_s30 }
  0x14   : > { %s3787_s25 = scalar_select %p3192_p3, 1, 0 }
  0x15   : > { %p2659_p4 = pneg %p3192_p3  ;;  %s3208_s13 = sshll.u32 %s3077_s12, 4  ;;  %s335_s13 = int_to_ptr.vmem [resolvable:$true] %s3208_s13 }
  0x16   : > { %s2811_s16 = scalar_lea.hbm %s3765_s1, 768 }
  0x17   : > { %p3202_p5 = pnand %p2659_p4, %p3187_p1  ;;  %p2812_p6 = scmp.ne.s32.totalorder %s3765_s1, %s2811_s16 }
  0x18   : > { %p2818_p10 = scmp.lt.u32.totalorder %s2811_s16, %s3765_s1 }
  0x19   : > { %p3218_p7 = pneg %p3202_p5 }
  0x1b   : > { %p2814_p8 = pnand %p3218_p7, %p2812_p6 }
  0x1d   : > { %p2815_p9 = pneg %p2814_p8 }
  0x1f   : > { %p2820_p11 = pnand %p2818_p10, %p2815_p9 }
  0x21   : > { %2823 = shalt.err (!%p2820_p11)
}
  0x22   : > { %s2824_s23 = scalar_lea.vmem %s3196_s27, 768  ;;  %p2832_p2 = scmp.lt.s32.totalorder %s3196_s27, %s3196_s27 }
  0x23   : > { %p2825_p12 = scmp.ne.s32.totalorder %s3196_s27, %s2824_s23  ;;  %p2833_p4 = scmp.lt.s32.totalorder %s2824_s23, %s2824_s23 }
  0x25   : > { %p2827_p13 = pnand %p2825_p12, %p3218_p7  ;;  %p2834_p6 = por %p2833_p4, %p2832_p2 }
  0x27   : > { %p2828_p0 = pneg %p2827_p13 }
  0x29   : > { %p2835_p8 = pnand %p2834_p6, %p2828_p0 }
  0x2b   : > { %2838 = shalt.err (!%p2835_p8)
}
  0x2c   : > { %s3078_s14 = smov 384   ;;  %s3079_s15 = smov 24  }
  0x2d   : > { %2662 = dma.hbm_to_vmem [thread:$0]  (!%p3202_p5), %s3765_s1, 768, %s3196_s27, [#allocation8], %s3078_s14, %s3078_s14, %s3079_s15  }
  0x2e   : > { %s2839_s23 = scalar_lea.hbm %s3769_s5, 768 }
  0x2f   : > { %p2840_p9 = scmp.ne.s32.totalorder %s3769_s5, %s2839_s23  ;;  %p2846_p12 = scmp.lt.u32.totalorder %s2839_s23, %s3769_s5 }
  0x31   : > { %p2842_p10 = pnand %p2840_p9, %p3218_p7 }
  0x33   : > { %p2843_p11 = pneg %p2842_p10 }
  0x35   : > { %p2848_p13 = pnand %p2846_p12, %p2843_p11 }
  0x37   : > { %2851 = shalt.err (!%p2848_p13)
}
  0x38   : > { %s2852_s27 = scalar_lea.vmem %s3206_s30, 768  ;;  %p2860_p6 = scmp.lt.s32.totalorder %s3206_s30, %s3206_s30 }
  0x39   : > { %p2853_p0 = scmp.ne.s32.totalorder %s3206_s30, %s2852_s27  ;;  %p2861_p8 = scmp.lt.s32.totalorder %s2852_s27, %s2852_s27 }
  0x3b   : > { %p2855_p2 = pnand %p2853_p0, %p3218_p7  ;;  %p2862_p9 = por %p2861_p8, %p2860_p6 }
  0x3d   : > { %p2856_p4 = pneg %p2855_p2 }
  0x3f   : > { %p2863_p10 = pnand %p2862_p9, %p2856_p4 }
  0x41   : > { %2866 = shalt.err (!%p2863_p10)
}
  0x42   : > { %2668 = dma.hbm_to_vmem [thread:$0]  (!%p3202_p5), %s3769_s5, 768, %s3206_s30, [#allocation11], %s3078_s14, %s3078_s14, %s3079_s15  }
  0x43   : > { %s2867_s16 = scalar_lea.hbm %s3766_s2, 6144 }
  0x44   : > { %p2868_p11 = scmp.ne.s32.totalorder %s3766_s2, %s2867_s16  ;;  %p2874_p0 = scmp.lt.u32.totalorder %s2867_s16, %s3766_s2 }
  0x46   : > { %p2870_p12 = pnand %p2868_p11, %p3218_p7 }
  0x48   : > { %p2871_p13 = pneg %p2870_p12 }
  0x4a   : > { %p2876_p2 = pnand %p2874_p0, %p2871_p13 }
  0x4c   : > { %2879 = shalt.err (!%p2876_p2)
}
  0x4d   : > { %s2880_s27 = scalar_lea.vmem %s335_s13, 6144  ;;  %p2888_p9 = scmp.lt.s32.totalorder %s335_s13, %s335_s13 }
  0x4e   : > { %p2881_p4 = scmp.ne.s32.totalorder %s335_s13, %s2880_s27  ;;  %p2889_p10 = scmp.lt.s32.totalorder %s2880_s27, %s2880_s27 }
  0x50   : > { %p2883_p6 = pnand %p2881_p4, %p3218_p7  ;;  %p2890_p3 = por %p2889_p10, %p2888_p9 }
  0x52   : > { %p2884_p8 = pneg %p2883_p6 }
  0x54   : > { %p2891_p1 = pnand %p2890_p3, %p2884_p8 }
  0x56   : > { %2894 = shalt.err (!%p2891_p1)
}
  0x57   : > { %2665 = dma.hbm_to_vmem [thread:$0]  (!%p3202_p5), %s3766_s2, 6144, %s335_s13, [#allocation8], %s3078_s14, %s3078_s14, %s3079_s15  }
  0x58   : > { %s3080_s6 = smov [#allocation12]   ;;  %s2895_s26 = scalar_lea.hbm %s3772_s8, 2048 }
  0x59   : > { %s372_s7 = sshll.u32 %s3080_s6, 4  ;;  %p2896_p1 = scmp.ne.s32.totalorder %s3772_s8, %s2895_s26  ;;  %s373_s7 = int_to_ptr.vmem [resolvable:$true] %s372_s7 }
  0x5a   : > { %p2902_p12 = scmp.lt.u32.totalorder %s2895_s26, %s3772_s8 }
  0x5b   : > { %p2898_p3 = pnand %p2896_p1, %p3218_p7 }
  0x5d   : > { %p2899_p11 = pneg %p2898_p3 }
  0x5f   : > { %p2904_p13 = pnand %p2902_p12, %p2899_p11 }
  0x61   : > { %2907 = shalt.err (!%p2904_p13)
}
  0x62   : > { %s2908_s13 = scalar_lea.vmem %s373_s7, 2048  ;;  %p2916_p6 = scmp.lt.s32.totalorder %s373_s7, %s373_s7 }
  0x63   : > { %p2909_p0 = scmp.ne.s32.totalorder %s373_s7, %s2908_s13  ;;  %p2917_p8 = scmp.lt.s32.totalorder %s2908_s13, %s2908_s13 }
  0x65   : > { %p2911_p2 = pnand %p2909_p0, %p3218_p7  ;;  %p2918_p9 = por %p2917_p8, %p2916_p6 }
  0x67   : > { %p2912_p4 = pneg %p2911_p2 }
  0x69   : > { %p2919_p10 = pnand %p2918_p9, %p2912_p4 }
  0x6b   : > { %2922 = shalt.err (!%p2919_p10)
}
  0x6c   : > { %s3081_s14 = smov 128   ;;  %s3082_s15 = smov 8  }
  0x6d   : > { %2671 = dma.hbm_to_vmem [thread:$0]  (!%p3202_p5), %s3772_s8, 2048, %s373_s7, [#allocation11], %s3081_s14, %s3081_s14, %s3082_s15  }
  0x6e   : > { %s3083_s6 = smov [#allocation13]   ;;  %s2923_s29 = scalar_lea.hbm %s3773_s9, 2048 }
  0x6f   : > { %s385_s10 = sshll.u32 %s3083_s6, 4  ;;  %p2924_p1 = scmp.ne.s32.totalorder %s3773_s9, %s2923_s29  ;;  %s386_s10 = int_to_ptr.vmem [resolvable:$true] %s385_s10 }
  0x70   : > { %p2930_p12 = scmp.lt.u32.totalorder %s2923_s29, %s3773_s9 }
  0x71   : > { %p2926_p3 = pnand %p2924_p1, %p3218_p7 }
  0x73   : > { %p2927_p11 = pneg %p2926_p3 }
  0x75   : > { %p2932_p13 = pnand %p2930_p12, %p2927_p11 }
  0x77   : > { %2935 = shalt.err (!%p2932_p13)
}
  0x78   : > { %s2936_s7 = scalar_lea.vmem %s386_s10, 2048  ;;  %p2944_p6 = scmp.lt.s32.totalorder %s386_s10, %s386_s10 }
  0x79   : > { %p2937_p0 = scmp.ne.s32.totalorder %s386_s10, %s2936_s7  ;;  %p2945_p8 = scmp.lt.s32.totalorder %s2936_s7, %s2936_s7 }
  0x7b   : > { %p2939_p2 = pnand %p2937_p0, %p3218_p7  ;;  %p2946_p9 = por %p2945_p8, %p2944_p6 }
  0x7d   : > { %p2940_p4 = pneg %p2939_p2 }
  0x7f   : > { %p2947_p10 = pnand %p2946_p9, %p2940_p4 }
  0x81   : > { %2950 = shalt.err (!%p2947_p10)
}
  0x82   : > { %2674 = dma.hbm_to_vmem [thread:$0]  (!%p3202_p5), %s3773_s9, 2048, %s386_s10, [#allocation14], %s3081_s14, %s3081_s14, %s3082_s15  }
  0x83   : > { %s37_s11 = sadd.s32 1, %s3069_s21  ;;  %s49_s28 = sadd.s32 1, %s3061_s19 }
  0x84   : > { %p38_p7 = scmp.ge.s32.totalorder %s37_s11, 2  ;;  %p56_p1 = scmp.ne.s32.totalorder %s3061_s19, %s3057_s18 }
  0x85   : > { %p57_p3 = scmp.eq.s32.totalorder %s3073_s22, 0  ;;  %p62_p12 = scmp.ne.s32.totalorder %s3057_s18, %s3053_s17 }
  0x86   : > { %s3809_s11 = smov (%p38_p7, %s37_s11), 0  ;;  %p2684_p13 = scmp.lt.s32.totalorder %s3073_s22, 2 }
  0x87   : > { %p3339_p11 = por %p57_p3, %p56_p1  ;;  %s44_s16 = ssub.s32 %s3069_s21, %s3809_s11 }
  0x88   : > { %p47_p0 = scmp.eq.s32.totalorder %s44_s16, 0  ;;  %p3791_p2 = scmp.ne.s32.totalorder %s3786_s24, 0 }
  0x89   : > { %s402_s26 = sand.u32 1, %s3061_s19   ;;  %s1991_s29 = sshll.u32 %s3069_s21, 9 }
  0x8a   : > { %p3350_p4 = por %p3791_p2, %p62_p12  ;;  %s1950_s23 = sshll.u32 %s402_s26, 5 }
  0x8b   : > { %s3357_s12 = scalar_select %p47_p0, %s3061_s19, %s49_s28  }
  0x8c   : > { %s3362_s7 = scalar_lea.hbm %s3764_s0, %s1991_s29  ;;  %s406_s17 = scalar_lea.vmem [#allocation4], %s1950_s23 }
  0x8d   : > { %s414_s30 = sshll.u32 %s406_s17, 4  ;;  %p3366_p5 = pnand %p2684_p13, %p3339_p11  ;;  %s3370_s30 = int_to_ptr.vmem [resolvable:$true] %s414_s30 }
  0x8e   : > { %s3372_s28 = scalar_lea.sflag [#allocation5], %s402_s26  ;;  %s2951_s16 = scalar_lea.hbm %s3362_s7, 512 }
  0x8f   : > { %p2952_p6 = scmp.ne.s32.totalorder %s3362_s7, %s2951_s16  ;;  %p2953_p8 = pneg %p3366_p5 }
  0x90   : > { %s2956_s23 = scalar_lea.hbm %s3764_s0, 1024  ;;  %p2957_p7 = scmp.lt.u32.totalorder %s3362_s7, %s3764_s0 }
  0x91   : > { %p2954_p9 = pnand %p2953_p8, %p2952_p6  ;;  %p2958_p1 = scmp.lt.u32.totalorder %s2956_s23, %s2951_s16 }
  0x92   : > { %p2960_p11 = scmp.lt.u32.totalorder %s2951_s16, %s3362_s7 }
  0x93   : > { %p2955_p10 = pneg %p2954_p9  ;;  %p2959_p3 = por %p2958_p1, %p2957_p7 }
  0x95   : > { %p2961_p12 = por %p2960_p11, %p2959_p3 }
  0x97   : > { %p2962_p13 = pnand %p2961_p12, %p2955_p10 }
  0x99   : > { %2965 = shalt.err (!%p2962_p13)
}
  0x9a   : > { %s2966_s26 = scalar_lea.vmem %s3370_s30, 512  ;;  %s3084_s17 = smov [#allocation4]  }
  0x9b   : > { %p2967_p0 = scmp.ne.s32.totalorder %s3370_s30, %s2966_s26  ;;  %s2971_s29 = sshll.u32 %s3084_s17, 4  ;;  %s2972_s29 = int_to_ptr.vmem [resolvable:$false] %s2971_s29 }
  0x9c   : > { %s2973_s6 = scalar_lea.vmem %s2972_s29, 1024  ;;  %p2974_p9 = scmp.lt.s32.totalorder %s3370_s30, %s2972_s29 }
  0x9d   : > { %p2969_p2 = pnand %p2967_p0, %p2953_p8  ;;  %p2975_p7 = scmp.lt.s32.totalorder %s2973_s6, %s2966_s26 }
  0x9f   : > { %p2970_p6 = pneg %p2969_p2  ;;  %p2976_p1 = por %p2975_p7, %p2974_p9 }
  0xa1   : > { %p2977_p3 = pnand %p2976_p1, %p2970_p6 }
  0xa3   : > { %2980 = shalt.err (!%p2977_p3)
}
  0xa4   : > { %2678 = dma.hbm_to_vmem [thread:$0]  (!%p3366_p5), %s3362_s7, 512, %s3370_s30, %s3372_s28, %s3081_s14, %s3081_s14, %s3082_s15  }
  0xa5   : > { %p3794_p8 = scmp.ne.s32.totalorder %s3787_s25, 0 }
  0xa6   : > { %s428_s16 = sand.u32 (!%p3794_p8), 1, %s3057_s18  }
  0xa7   : > { %426 = sbr.rel (%p3794_p8) target bundleno = 1792 (0x700), region = 64  ;;  %s1954_s23 = sshll.u32 (!%p3794_p8), %s428_s16, 5 }
  0xa8   : > { %s429_s27 = scalar_lea.sflag (!%p3794_p8), [#allocation5], %s428_s16  ;;  %s3406_s13 = scalar_lea.vmem (!%p3794_p8), [#allocation4], %s1954_s23 }
  0xae   : > { %3032 = dma.done.wait (%p3350_p4), %s429_s27, 512  }
  0xaf   : > { %3034 = vsyncadd (%p3350_p4), %s429_s27, 4294966784  ;;  %p3795_p10 = scmp.ne.s32.totalorder %s3786_s24, 0 }
  0xb1   : > { %3036 = dma.done.wait (%p3795_p10), [#allocation8], 6912  }
  0xb2   : > { %3038 = vsyncadd (%p3795_p10), [#allocation8], 4294960384 }
  0xb3   : > { %3040 = dma.done.wait (%p3795_p10), [#allocation11], 2816  }
  0xb4   : > { %3042 = vsyncadd (%p3795_p10), [#allocation11], 4294964480 }
  0xb5   : > { %3044 = dma.done.wait (%p3795_p10), [#allocation14], 2048  }
  0xb6   : > { %3046 = vsyncadd (%p3795_p10), [#allocation14], 4294965248  ;;  %p1960_p4 = scmp.ne.s32.totalorder %s3065_s20, 0 }
  0xb7   : > { %v3085_v0 = vmov (!%p1960_p4), 0.0  }
  0xb8   : > { %490 = sbr.rel (%p1960_p4) target bundleno = 191 (0xbf), region = 92  ;;  %491 = vst [vmem:[#allocation2] sm:$0xff] (!%p1960_p4), %v3085_v0 }
  0xbf PF: > { %v497_v1 = vld [vmem:[#allocation7 + $0x8] sm:$0xff]  ;;  %v500_v2 = vld [vmem:[#allocation7 + $0x20] sm:$0xff]  ;;  %v499_v5 = vld [vmem:[#allocation7 + $0x18] sm:$0xff]  ;;  %v3086_v6 = vmov 0.0   ;;  %vm519_vm0 = vcmask 130048   ;;  %v3087_v42 = vmov 0.0|0.0  }
  0xc0   : > { %v496_v3 = vld [vmem:[#allocation7] sm:$0xff]  ;;  %v2330_v4 = vpack.c.bf16 %v500_v2, %v497_v1  ;;  %596 = vmatprep.mubr.f32.mxu0 %v3086_v6  ;;  %v719_v7 = vld [vmem:[#allocation9 + $0x8] sm:$0xff]  ;;  %v722_v8 = vld [vmem:[#allocation9 + $0x20] sm:$0xff]  ;;  %vm3088_vm1 = vmmov 0   ;;  %s3796_s10 = sld [smem:[#allocation21_spill]]  ;;  %p1978_p5 = scmp.ne.s32.totalorder %s3065_s20, 1 }
  0xc1   : > { %v2332_v9 = vpack.c.bf16 %v499_v5, %v496_v3  ;;  %v3426_v10 = vpack.c.bf16 %v722_v8, %v719_v7  ;;  %v492_v11 = vld [vmem:[%s3406_s13] sm:$0xff]  ;;  %v718_v12 = vld [vmem:[#allocation9] sm:$0xff]  ;;  %v721_v13 = vld [vmem:[#allocation9 + $0x18] sm:$0xff]  ;;  %vm3091_vm2 = vmmov (!%p1978_p5), 0   ;;  %s3797_s30 = sld [smem:[#allocation22_spill]] (!%p1978_p5)  ;;  %s3798_s26 = sld [smem:[#allocation23_spill]] (!%p1978_p5) }
  0xc2   : > { %2331 = vmatprep.subr.bf16.mxu0 %v2330_v4  ;;  %v725_v14 = vld [vmem:[#allocation9 + $0x38] sm:$0xff]  ;;  %v728_v15 = vld [vmem:[#allocation9 + $0x50] sm:$0xff]  ;;  %2107 = vmatprep.mubr.msk.f32.mxu1 %vm519_vm0, %v492_v11  ;;  %v3430_v16 = vpack.c.bf16 %v721_v13, %v718_v12  ;;  %v727_v19 = vld [vmem:[#allocation9 + $0x48] sm:$0xff]  ;;  %s3799_s6 = sld [smem:[#allocation24_spill]] (!%p1978_p5) }
  0xc3   : > { %2333 = vmatpush1.bf16.msra.mxu0 %v2332_v9  ;;  %v3433_v17 = vpack.c.bf16 %v728_v15, %v725_v14  ;;  %v724_v18 = vld [vmem:[#allocation9 + $0x30] sm:$0xff]  ;;  %v731_v20 = vld [vmem:[#allocation9 + $0x68] sm:$0xff]  ;;  %v734_v21 = vld [vmem:[#allocation9 + $0x80] sm:$0xff] }
  0xc4   : > { %2339 = vmatprep.subr.bf16.mxu0 %v3426_v10  ;;  %v3437_v22 = vpack.c.bf16 %v727_v19, %v724_v18  ;;  %v730_v23 = vld [vmem:[#allocation9 + $0x60] sm:$0xff]  ;;  %v493_v24 = vld [vmem:[%s3406_s13 + $0x8] sm:$0xff]  ;;  %v3442_v25 = vpack.c.bf16 %v734_v21, %v731_v20  ;;  %v740_v30 = vld [vmem:[#allocation9 + $0xb0] sm:$0xff] }
  0xc5   : > { %v733_v26 = vld [vmem:[#allocation9 + $0x78] sm:$0xff]  ;;  %v498_v27 = vld [vmem:[#allocation7 + $0x10] sm:$0xff]  ;;  %v720_v34 = vld [vmem:[#allocation9 + $0x10] sm:$0xff] }
  0xc6   : > { %1961 = vmatmul.mubr.msk.f32.vlgmr.msra.gmra.mrb[0].mxu0 %vm519_vm0, %v492_v11  ;;  %v501_v28 = vld [vmem:[#allocation7 + $0x28] sm:$0xff]  ;;  %v3446_v32 = vpack.c.bf16 %v733_v26, %v730_v23  ;;  %v494_v33 = vld [vmem:[%s3406_s13 + $0x10] sm:$0xff]  ;;  %v723_v35 = vld [vmem:[#allocation9 + $0x28] sm:$0xff] }
  0xc7   : > { %2341 = vmatpush1.bf16.msra.mxu0 %v3430_v16  ;;  %602 = vmatprep.mubr.f32.mxu0 %v3086_v6  ;;  %v737_v29 = vld [vmem:[#allocation9 + $0x98] sm:$0xff]  ;;  %v2334_v31 = vpack.c.bf16 %v501_v28, %v498_v27  ;;  %v736_v37 = vld [vmem:[#allocation9 + $0x90] sm:$0xff]  ;;  %v739_v38 = vld [vmem:[#allocation9 + $0xa8] sm:$0xff]  ;;  %v3452_v39 = vpack.c.bf16 %v723_v35, %v720_v34 }
  0xc8   : > { %2343 = vmatprep.subr.bf16.mxu0 %v3433_v17  ;;  %v3450_v36 = vpack.c.bf16 %v740_v30, %v737_v29  ;;  %v743_v40 = vld [vmem:[#allocation9 + $0xc8] sm:$0xff]  ;;  %v746_v41 = vld [vmem:[#allocation9 + $0xe0] sm:$0xff]  ;;  %v729_v44 = vld [vmem:[#allocation9 + $0x58] sm:$0xff]  ;;  %v3458_v45 = vpack.c.bf16 %v739_v38, %v736_v37 }
  0xc9   : > { %2335 = vmatprep.subr.bf16.mxu1 %v2334_v31  ;;  %v726_v43 = vld [vmem:[#allocation9 + $0x40] sm:$0xff]  ;;  %v495_v46 = vld [vmem:[%s3406_s13 + $0x18] sm:$0xff]  ;;  %v3463_v47 = vpack.c.bf16 %v746_v41, %v743_v40  ;;  %v745_v49 = vld [vmem:[#allocation9 + $0xd8] sm:$0xff] }
  0xca   : > { %1962 = vmatmul.mubr.msk.f32.gmra.mrb[2].mxu0 %vm519_vm0, %v493_v24  ;;  %2337 = vmatpush3.bf16.msra.mxu1 %v2334_v31  ;;  %v742_v48 = vld [vmem:[#allocation9 + $0xc0] sm:$0xff]  ;;  %v749_v50 = vld [vmem:[#allocation9 + $0xf8] sm:$0xff]  ;;  %v3466_v51 = vpack.c.bf16 %v729_v44, %v726_v43  ;;  %v752_v52 = vld [vmem:[#allocation9 + $0x110] sm:$0xff]  ;;  %v504_v31 = vlaneseq }
  0xcb   : > { %2345 = vmatpush1.bf16.msra.mxu0 %v3437_v22  ;;  %608 = vmatprep.mubr.f32.mxu0 %v3086_v6  ;;  %v732_v53 = vld [vmem:[#allocation9 + $0x70] sm:$0xff]  ;;  %v735_v54 = vld [vmem:[#allocation9 + $0x88] sm:$0xff]  ;;  %v3473_v55 = vpack.c.bf16 %v745_v49, %v742_v48  ;;  %v3477_v56 = vpack.c.bf16 %v752_v52, %v749_v50  ;;  %v758_v61 = vld [vmem:[#allocation9 + $0x140] sm:$0xff] }
  0xcc   : > { %2347 = vmatprep.subr.bf16.mxu0 %v3442_v25  ;;  %2370 = vmatprep.subr.bf16.mxu1 %v3087_v42  ;;  %v748_v57 = vld [vmem:[#allocation9 + $0xf0] sm:$0xff]  ;;  %v751_v58 = vld [vmem:[#allocation9 + $0x108] sm:$0xff]  ;;  %v3480_v60 = vpack.c.bf16 %v735_v54, %v732_v53  ;;  %v738_v62 = vld [vmem:[#allocation9 + $0xa0] sm:$0xff] }
  0xcd   : > { %2108 = vmatmul.mubr.msk.f32.vlgmr.msra.gmra.mrb[0].mxu1 %vm519_vm0, %v493_v24  ;;  %v755_v59 = vld [vmem:[#allocation9 + $0x128] sm:$0xff]  ;;  %v741_v63 = vld [vmem:[#allocation9 + $0xb8] sm:$0xff]  ;;  %v3487_v0 = vpack.c.bf16 %v751_v58, %v748_v57  ;;  %v754_v2 = vld [vmem:[#allocation9 + $0x120] sm:$0xff] }
  0xce   : > { %1963 = vmatmul.mubr.msk.f32.gmra.mrb[4].mxu0 %vm519_vm0, %v494_v33  ;;  %2372 = vmatpush3.bf16.msra.mxu1 %v3452_v39  ;;  %v3490_v1 = vpack.c.bf16 %v758_v61, %v755_v59  ;;  %v757_v3 = vld [vmem:[#allocation9 + $0x138] sm:$0xff]  ;;  %v3493_v5 = vpack.c.bf16 %v741_v63, %v738_v62  ;;  %v764_v7 = vld [vmem:[#allocation9 + $0x170] sm:$0xff]  ;;  %v747_v9 = vld [vmem:[#allocation9 + $0xe8] sm:$0xff] }
  0xcf   : > { %2349 = vmatpush1.bf16.msra.mxu0 %v3446_v32  ;;  %614 = vmatprep.mubr.f32.mxu0 %v3086_v6  ;;  %v761_v4 = vld [vmem:[#allocation9 + $0x158] sm:$0xff]  ;;  %v744_v8 = vld [vmem:[#allocation9 + $0xd0] sm:$0xff]  ;;  %v3497_v11 = vpack.c.bf16 %v757_v3, %v754_v2  ;;  %v763_v14 = vld [vmem:[#allocation9 + $0x168] sm:$0xff] }
  0xd0   : > { %2351 = vmatprep.subr.bf16.mxu0 %v3450_v36  ;;  %2373 = vmatprep.subr.bf16.mxu1 %v3087_v42  ;;  %v3500_v12 = vpack.c.bf16 %v764_v7, %v761_v4  ;;  %v760_v13 = vld [vmem:[#allocation9 + $0x150] sm:$0xff]  ;;  %v3503_v15 = vpack.c.bf16 %v747_v9, %v744_v8  ;;  %v750_v18 = vld [vmem:[#allocation9 + $0x100] sm:$0xff]  ;;  %v753_v19 = vld [vmem:[#allocation9 + $0x118] sm:$0xff] }
  0xd1   : > { %2110 = vmatprep.mubr.msk.f32.mxu1 %vm519_vm0, %v494_v33  ;;  %v3507_v20 = vpack.c.bf16 %v763_v14, %v760_v13  ;;  %v3511_v21 = vpack.c.bf16 %v753_v19, %v750_v18  ;;  %v756_v23 = vld [vmem:[#allocation9 + $0x130] sm:$0xff]  ;;  %v759_v24 = vld [vmem:[#allocation9 + $0x148] sm:$0xff]  ;;  %v762_v28 = vld [vmem:[#allocation9 + $0x160] sm:$0xff]  ;;  %v3565_v33 = vshrl.u32 %v504_v31, 7 }
  0xd2   : > { %1964 = vmatmul.mubr.msk.f32.gmra.mrb[6].mxu0 %vm519_vm0, %v495_v46  ;;  %2375 = vmatpush3.bf16.msra.mxu1 %v3466_v51  ;;  %v3515_v26 = vld [vmem:[#allocation2] sm:$0xff]  ;;  %v3518_v27 = vpack.c.bf16 %v759_v24, %v756_v23  ;;  %v765_v29 = vld [vmem:[#allocation9 + $0x178] sm:$0xff] }
  0xd3   : > { %2353 = vmatpush1.bf16.msra.mxu0 %v3458_v45  ;;  %838 = vmatprep.mubr.f32.mxu0 %v3086_v6  ;;  %v3526_v30 = vpack.c.bf16 %v765_v29, %v762_v28  ;;  %v514_v34 = vsub.s32 2, %v3565_v33  ;;  %v502_v35 = vld [vmem:[%s3767_s3] sm:$0x7]  ;;  %v506_v49 = vsub.s32 0, %v3565_v33  ;;  %v510_v54 = vsub.s32 1, %v3565_v33 }
  0xd4   : > { %2355 = vmatprep.subr.bf16.mxu0 %v3463_v47  ;;  %2376 = vmatprep.subr.bf16.mxu1 %v3087_v42  ;;  %v3594_v7 = vld [vmem:[%s3796_s10] ss:$0 sm:$0xff] }
  0xd5   : > { %2111 = vmatmul.mubr.msk.f32.gmra.mrb[2].mxu1 %vm519_vm0, %v495_v46  ;;  %v515_v37 = vrot.slane %v502_v35, %v514_v34  ;;  %v3582_v50 = vrot.slane %v502_v35, %v506_v49  ;;  %v3588_v59 = vrot.slane %v502_v35, %v510_v54 }
  0xd6   : > { %2145 = vmatprep.mubr.msk.f32.mxu1 %vm3088_vm1, %v3086_v6  ;;  %2378 = vmatpush3.bf16.msra.mxu1 %v3480_v60 }
  0xd7   : > { %2357 = vmatpush1.bf16.msra.mxu0 %v3473_v55  ;;  %2379 = vmatprep.subr.bf16.mxu1 %v3087_v42 }
  0xd8   : > { %2359 = vmatprep.subr.bf16.mxu0 %v3477_v56 }
  0xda   : > { %2381 = vmatpush3.bf16.msra.mxu1 %v3493_v5 }
  0xdb   : > { %2361 = vmatpush1.bf16.msra.mxu0 %v3487_v0  ;;  %2382 = vmatprep.subr.bf16.mxu1 %v3087_v42 }
  0xdc   : > { %2363 = vmatprep.subr.bf16.mxu0 %v3490_v1 }
  0xde   : > { %2384 = vmatpush3.bf16.msra.mxu1 %v3503_v15 }
  0xdf   : > { %2365 = vmatpush1.bf16.msra.mxu0 %v3497_v11  ;;  %2385 = vmatprep.subr.bf16.mxu1 %v3087_v42 }
  0xe0   : > { %2367 = vmatprep.subr.bf16.mxu0 %v3500_v12 }
  0xe2   : > { %2387 = vmatpush3.bf16.msra.mxu1 %v3511_v21 }
  0xe3   : > { %2369 = vmatpush1.bf16.msra.mxu0 %v3507_v20  ;;  %2388 = vmatprep.subr.bf16.mxu1 %v3087_v42 }
  0xe4   : > { %2395 = vmatprep.subr.bf16.mxu0 %v3426_v10 }
  0xe6   : > { %839 = vmatmul.mubr.f32.vlgmr.msra.gmra.mrb[0].mxu0 %v3515_v26  ;;  %2390 = vmatpush3.bf16.msra.mxu1 %v3518_v27 }
  0xe7   : > { %2397 = vmatpush1.bf16.msra.mxu0 %v3430_v16  ;;  %1003 = vmatprep.mubr.f32.mxu0 %v3086_v6 }
  0xe8   : > { %2399 = vmatprep.subr.bf16.mxu0 %v3433_v17  ;;  %2391 = vmatprep.subr.bf16.mxu1 %v3087_v42 }
  0xea   : > { %2393 = vmatpush3.bf16.msra.mxu1 %v3526_v30 }
  0xeb   : > { %2401 = vmatpush1.bf16.msra.mxu0 %v3437_v22  ;;  %2426 = vmatprep.subr.bf16.mxu1 %v3087_v42 }
  0xec   : > { %2403 = vmatprep.subr.bf16.mxu0 %v3442_v25 }
  0xed   : > { %2146 = vmatmul.mubr.f32.vlgmr.msra.gmra.mrb[4].mxu1 %v3515_v26 }
  0xee   : > { %2428 = vmatpush3.bf16.msra.mxu1 %v3452_v39  ;;  %2180 = vmatprep.mubr.msk.f32.mxu1 %vm3088_vm1, %v3086_v6 }
  0xef   : > { %2405 = vmatpush1.bf16.msra.mxu0 %v3446_v32  ;;  %2429 = vmatprep.subr.bf16.mxu1 %v3087_v42 }
  0xf0   : > { %2407 = vmatprep.subr.bf16.mxu0 %v3450_v36 }
  0xf2   : > { %2431 = vmatpush3.bf16.msra.mxu1 %v3466_v51 }
  0xf3   : > { %2409 = vmatpush1.bf16.msra.mxu0 %v3458_v45  ;;  %2432 = vmatprep.subr.bf16.mxu1 %v3087_v42 }
  0xf4   : > { %2411 = vmatprep.subr.bf16.mxu0 %v3463_v47 }
  0xf6   : > { %2434 = vmatpush3.bf16.msra.mxu1 %v3480_v60 }
  0xf7   : > { %2413 = vmatpush1.bf16.msra.mxu0 %v3473_v55  ;;  %2435 = vmatprep.subr.bf16.mxu1 %v3087_v42 }
  0xf8   : > { %2415 = vmatprep.subr.bf16.mxu0 %v3477_v56 }
  0xfa   : > { %2437 = vmatpush3.bf16.msra.mxu1 %v3493_v5 }
  0xfb   : > { %2417 = vmatpush1.bf16.msra.mxu0 %v3487_v0  ;;  %2438 = vmatprep.subr.bf16.mxu1 %v3087_v42 }
  0xfc   : > { %2419 = vmatprep.subr.bf16.mxu0 %v3490_v1 }
  0xfe   : > { %2440 = vmatpush3.bf16.msra.mxu1 %v3503_v15 }
  0xff   : > { %2421 = vmatpush1.bf16.msra.mxu0 %v3497_v11  ;;  %2441 = vmatprep.subr.bf16.mxu1 %v3087_v42 }
 0x100   : > { %2423 = vmatprep.subr.bf16.mxu0 %v3500_v12 }
 0x102   : > { %2443 = vmatpush3.bf16.msra.mxu1 %v3511_v21 }
 0x103   : > { %2425 = vmatpush1.bf16.msra.mxu0 %v3507_v20  ;;  %2444 = vmatprep.subr.bf16.mxu1 %v3087_v42 }
 0x104   : > { %2451 = vmatprep.subr.bf16.mxu0 %v3426_v10 }
 0x106   : > { %2446 = vmatpush3.bf16.msra.mxu1 %v3518_v27 }
 0x107   : > { %2447 = vmatprep.subr.bf16.mxu1 %v3087_v42 }
 0x10a   : > { %2449 = vmatpush3.bf16.msra.mxu1 %v3526_v30 }
 0x10b   : > { %2482 = vmatprep.subr.bf16.mxu1 %v3087_v42 }
 0x1a0   : > { %v2109_v38 = vpop.f32.mrb[0].mxu1 }
 0x1a1   : > { %v3573_v40 = vadd.f32 %v2109_v38, %v515_v37  ;;  %v687_v41 = vpop.f32.mrb[1].mxu1 }
 0x1a2   : > { %v688_v14 = vadd.f32 %v687_v41, %v515_v37 }
 0x1a8   : > { %v2112_v43 = vpop.f32.mrb[2].mxu1 }
 0x1a9   : > { %v3575_v44 = vadd.f32 %v2112_v43, %v515_v37  ;;  %v697_v46 = vpop.f32.mrb[3].mxu1 }
 0x1aa   : > { %v3577_v48 = vadd.f32 %v697_v46, %v515_v37 }
 0x1b9   : > { %v840_v52 = vpop.f32.mrb[0].mxu0 }
 0x1ba   : > { %v2617_v53 = vadd.f32 %v840_v52, %v3582_v50  ;;  %v842_v57 = vpop.f32.mrb[1].mxu0 }
 0x1bb   : > { %v2618_v61 = vadd.f32 %v842_v57, %v3588_v59 }
 0x1bc   : > { %v1970_v58 = vmul.f32 -1.442695, %v2617_v53 }
 0x1bd   : > { %v1971_v2 = vmul.f32 -1.442695, %v2618_v61 }
 0x1be   : > { %2757 = vpow2.f32 %v1970_v58 }
 0x1bf   : > { %2759 = vpow2.f32 %v1971_v2 }
 0x1c0   : > { %v911_v62 = vpop.f32.mrb[4].mxu1 }
 0x1c1   : > { %v2147_v63 = vpop.f32.mrb[5].mxu1  ;;  %v932_v8 = vadd.f32 %v3594_v7, %v911_v62 }
 0x1c8   : > { %v2758_v3 = vpop.eup %2757 }
 0x1c9   : > { %v922_v4 = vadd.f32 1.0, %v2758_v3  ;;  %v2760_v9 = vpop.eup %2759 }
 0x1ca   : > { %v929_v19 = vadd.f32 1.0, %v2760_v9 }
 0x1cb   : > { %2761 = vrcp.f32 %v922_v4 }
 0x1d5   : > { %v2762_v13 = vpop.eup %2761 }
 0x1d6   : > { %v933_v18 = vmul.f32 %v2762_v13, %v932_v8 }
 0x1d8   : > { %v934_v23 = vadd.f32 %v933_v18, %v688_v14 }
 0x1da   : > { %2763 = vtanh.f32 %v934_v23 }
 0x1db   : > { %2765 = vrcp.f32 %v929_v19 }
 0x1e4   : > { %v2764_v24 = vpop.eup %2763 }
 0x1e5   : > { %v936_v28 = vsub.f32 %v3515_v26, %v2764_v24  ;;  %v2766_v29 = vpop.eup %2765 }
 0x1e7   : > { %v937_v31 = vmul.f32 %v2766_v29, %v936_v28 }
 0x1e9   : > { %v938_v35 = vadd.f32 %v2764_v24, %v937_v31 }
 0x1eb   : > { %1004 = vmatmul.mubr.f32.vlgmr.msra.gmra.mrb[2].mxu0 %v938_v35  ;;  %2181 = vmatmul.mubr.f32.vlgmr.msra.gmra.mrb[6].mxu1 %v938_v35 }
 0x1ec   : > { %2453 = vmatpush1.bf16.msra.mxu0 %v3430_v16  ;;  %2484 = vmatpush3.bf16.msra.mxu1 %v3452_v39 }
 0x1ed   : > { %2455 = vmatprep.subr.bf16.mxu0 %v3433_v17  ;;  %2485 = vmatprep.subr.bf16.mxu1 %v3087_v42 }
 0x1ee   : > { %1169 = vmatprep.mubr.f32.mxu0 %v3086_v6  ;;  %2215 = vmatprep.mubr.msk.f32.mxu1 %vm3088_vm1, %v3086_v6 }
 0x1f0   : > { %2457 = vmatpush1.bf16.msra.mxu0 %v3437_v22  ;;  %2487 = vmatpush3.bf16.msra.mxu1 %v3466_v51 }
 0x1f1   : > { %2459 = vmatprep.subr.bf16.mxu0 %v3442_v25  ;;  %2488 = vmatprep.subr.bf16.mxu1 %v3087_v42 }
 0x1f4   : > { %2461 = vmatpush1.bf16.msra.mxu0 %v3446_v32  ;;  %2490 = vmatpush3.bf16.msra.mxu1 %v3480_v60 }
 0x1f5   : > { %2463 = vmatprep.subr.bf16.mxu0 %v3450_v36  ;;  %2491 = vmatprep.subr.bf16.mxu1 %v3087_v42 }
 0x1f8   : > { %2465 = vmatpush1.bf16.msra.mxu0 %v3458_v45  ;;  %2493 = vmatpush3.bf16.msra.mxu1 %v3493_v5 }
 0x1f9   : > { %2467 = vmatprep.subr.bf16.mxu0 %v3463_v47  ;;  %2494 = vmatprep.subr.bf16.mxu1 %v3087_v42 }
 0x1fc   : > { %2469 = vmatpush1.bf16.msra.mxu0 %v3473_v55  ;;  %2496 = vmatpush3.bf16.msra.mxu1 %v3503_v15 }
 0x1fd   : > { %2471 = vmatprep.subr.bf16.mxu0 %v3477_v56  ;;  %2497 = vmatprep.subr.bf16.mxu1 %v3087_v42 }
 0x200   : > { %2473 = vmatpush1.bf16.msra.mxu0 %v3487_v0  ;;  %2499 = vmatpush3.bf16.msra.mxu1 %v3511_v21 }
 0x201   : > { %2475 = vmatprep.subr.bf16.mxu0 %v3490_v1  ;;  %2500 = vmatprep.subr.bf16.mxu1 %v3087_v42 }
 0x204   : > { %2477 = vmatpush1.bf16.msra.mxu0 %v3497_v11  ;;  %2502 = vmatpush3.bf16.msra.mxu1 %v3518_v27 }
 0x205   : > { %2479 = vmatprep.subr.bf16.mxu0 %v3500_v12  ;;  %2503 = vmatprep.subr.bf16.mxu1 %v3087_v42 }
 0x208   : > { %2481 = vmatpush1.bf16.msra.mxu0 %v3507_v20  ;;  %2505 = vmatpush3.bf16.msra.mxu1 %v3526_v30 }
 0x209   : > { %2507 = vmatprep.subr.bf16.mxu0 %v3426_v10  ;;  %2538 = vmatprep.subr.bf16.mxu1 %v3087_v42 }
 0x2be   : > { %v1005_v26 = vpop.f32.mrb[2].mxu0  ;;  %v1076_v37 = vpop.f32.mrb[6].mxu1 }
 0x2bf   : > { %v2619_v38 = vadd.f32 %v1005_v26, %v3582_v50  ;;  %v1007_v41 = vpop.f32.mrb[3].mxu0  ;;  %v2182_v43 = vpop.f32.mrb[7].mxu1  ;;  %v1098_v10 = vadd.f32 %v3594_v7, %v1076_v37 }
 0x2c0   : > { %v2620_v52 = vadd.f32 %v1007_v41, %v3588_v59 }
 0x2c1   : > { %v1972_v46 = vmul.f32 -1.442695, %v2619_v38 }
 0x2c2   : > { %v1973_v53 = vmul.f32 -1.442695, %v2620_v52  ;;  %v1444_v52 = vld [vmem:[#allocation10] sm:$0xff] (!%p1978_p5) }
 0x2c3   : > { %2767 = vpow2.f32 %v1972_v46  ;;  %v1445_v46 = vld [vmem:[#allocation10 + $0x8] sm:$0xff] (!%p1978_p5) }
 0x2c4   : > { %2769 = vpow2.f32 %v1973_v53 }
 0x2cd   : > { %v2768_v57 = vpop.eup %2767 }
 0x2ce   : > { %v1088_v58 = vadd.f32 1.0, %v2768_v57  ;;  %v2770_v61 = vpop.eup %2769  ;;  %v3089_v57 = vmov (!%p1978_p5), 0.0  }
 0x2cf   : > { %v1095_v3 = vadd.f32 1.0, %v2770_v61  ;;  %v1446_v61 = vld [vmem:[#allocation10 + $0x10] sm:$0xff] (!%p1978_p5) }
 0x2d0   : > { %2771 = vrcp.f32 %v1088_v58  ;;  %v3090_v58 = vmov (!%p1978_p5), 0.0|0.0  }
 0x2da   : > { %v2772_v62 = vpop.eup %2771 }
 0x2db   : > { %v1099_v63 = vmul.f32 %v2772_v62, %v1098_v10  ;;  %v1449_v62 = vld [vmem:[#allocation10 + $0x28] sm:$0xff] (!%p1978_p5) }
 0x2dd   : > { %v1100_v2 = vadd.f32 %v1099_v63, %v3573_v40  ;;  %v2567_v63 = vpack.c.bf16 (!%p1978_p5), %v1449_v62, %v1446_v61 }
 0x2df   : > { %2773 = vtanh.f32 %v1100_v2  ;;  %v1979_v2 = vld [vmem:[%s3406_s13 + $0x18] sm:$0xff] (!%p1978_p5) }
 0x2e0   : > { %2775 = vrcp.f32 %v1095_v3  ;;  %v1635_v3 = vld [vmem:[#allocation12] sm:$0xff] (!%p1978_p5) }
 0x2e9   : > { %v2774_v4 = vpop.eup %2773 }
 0x2ea   : > { %v1102_v8 = vsub.f32 %v938_v35, %v2774_v4  ;;  %v2776_v9 = vpop.eup %2775 }
 0x2ec   : > { %v1103_v13 = vmul.f32 %v2776_v9, %v1102_v8  ;;  %v1651_v9 = vld [vmem:[#allocation13] sm:$0xff] (!%p1978_p5) }
 0x2ee   : > { %v1104_v14 = vadd.f32 %v2774_v4, %v1103_v13  ;;  %v1636_v4 = vld [vmem:[#allocation12 + $0x8] sm:$0xff] (!%p1978_p5) }
 0x2ef   : > { %v2594_v8 = vpack.c.bf16 (!%p1978_p5), %v1636_v4, %v1635_v3  ;;  %v1652_v13 = vld [vmem:[#allocation13 + $0x8] sm:$0xff] (!%p1978_p5) }
 0x2f0   : > { %1170 = vmatmul.mubr.f32.vlgmr.msra.gmra.mrb[4].mxu0 %v1104_v14  ;;  %2216 = vmatmul.mubr.f32.vlgmr.msra.gmra.mrb[8].mxu1 %v1104_v14 }
 0x2f1   : > { %2509 = vmatpush1.bf16.msra.mxu0 %v3430_v16  ;;  %2540 = vmatpush3.bf16.msra.mxu1 %v3452_v39 }
 0x2f2   : > { %2511 = vmatprep.subr.bf16.mxu0 %v3433_v17  ;;  %2541 = vmatprep.subr.bf16.mxu1 %v3087_v42 }
 0x2f3   : > { %1335 = vmatprep.mubr.f32.mxu0 %v3086_v6  ;;  %2250 = vmatprep.mubr.msk.f32.mxu1 %vm3088_vm1, %v3086_v6 }
 0x2f5   : > { %2513 = vmatpush1.bf16.msra.mxu0 %v3437_v22  ;;  %2543 = vmatpush3.bf16.msra.mxu1 %v3466_v51 }
 0x2f6   : > { %2515 = vmatprep.subr.bf16.mxu0 %v3442_v25  ;;  %2544 = vmatprep.subr.bf16.mxu1 %v3087_v42 }
 0x2f9   : > { %2517 = vmatpush1.bf16.msra.mxu0 %v3446_v32  ;;  %2546 = vmatpush3.bf16.msra.mxu1 %v3480_v60 }
 0x2fa   : > { %2519 = vmatprep.subr.bf16.mxu0 %v3450_v36  ;;  %2547 = vmatprep.subr.bf16.mxu1 %v3087_v42 }
 0x2fd   : > { %2521 = vmatpush1.bf16.msra.mxu0 %v3458_v45  ;;  %2549 = vmatpush3.bf16.msra.mxu1 %v3493_v5 }
 0x2fe   : > { %2523 = vmatprep.subr.bf16.mxu0 %v3463_v47  ;;  %2550 = vmatprep.subr.bf16.mxu1 %v3087_v42 }
 0x301   : > { %2525 = vmatpush1.bf16.msra.mxu0 %v3473_v55  ;;  %2552 = vmatpush3.bf16.msra.mxu1 %v3503_v15 }
 0x302   : > { %2527 = vmatprep.subr.bf16.mxu0 %v3477_v56  ;;  %2553 = vmatprep.subr.bf16.mxu1 %v3087_v42 }
 0x305   : > { %2529 = vmatpush1.bf16.msra.mxu0 %v3487_v0  ;;  %2555 = vmatpush3.bf16.msra.mxu1 %v3511_v21 }
 0x306   : > { %2531 = vmatprep.subr.bf16.mxu0 %v3490_v1  ;;  %2556 = vmatprep.subr.bf16.mxu1 %v3087_v42 }
 0x309   : > { %2533 = vmatpush1.bf16.msra.mxu0 %v3497_v11  ;;  %2558 = vmatpush3.bf16.msra.mxu1 %v3518_v27 }
 0x30a   : > { %2535 = vmatprep.subr.bf16.mxu0 %v3500_v12  ;;  %2559 = vmatprep.subr.bf16.mxu1 %v3087_v42 }
 0x30d   : > { %2537 = vmatpush1.bf16.msra.mxu0 %v3507_v20  ;;  %2561 = vmatpush3.bf16.msra.mxu1 %v3526_v30 }
 0x30e   : > { %2566 = vmatprep.subr.bf16.mxu1 (!%p1978_p5), %v3090_v58 }
 0x3c3   : > { %v1171_v6 = vpop.f32.mrb[4].mxu0  ;;  %v1242_v16 = vpop.f32.mrb[8].mxu1 }
 0x3c4   : > { %v2621_v17 = vadd.f32 %v1171_v6, %v3582_v50  ;;  %v1173_v22 = vpop.f32.mrb[5].mxu0  ;;  %v2217_v25 = vpop.f32.mrb[9].mxu1  ;;  %v1264_v51 = vadd.f32 %v3594_v7, %v1242_v16  ;;  %v1637_v6 = vld [vmem:[#allocation12 + $0x10] sm:$0xff] (!%p1978_p5)  ;;  %v1638_v16 = vld [vmem:[#allocation12 + $0x18] sm:$0xff] (!%p1978_p5) }
 0x3c5   : > { %v2622_v36 = vadd.f32 %v1173_v22, %v3588_v59  ;;  %v1653_v22 = vld [vmem:[#allocation13 + $0x10] sm:$0xff] (!%p1978_p5)  ;;  %v1654_v25 = vld [vmem:[#allocation13 + $0x18] sm:$0xff] (!%p1978_p5) }
 0x3c6   : > { %v1974_v32 = vmul.f32 -1.442695, %v2621_v17  ;;  %v2597_v17 = vpack.c.bf16 (!%p1978_p5), %v1638_v16, %v1637_v6 }
 0x3c7   : > { %v1975_v39 = vmul.f32 -1.442695, %v2622_v36  ;;  %v1639_v36 = vld [vmem:[#allocation12 + $0x20] sm:$0xff] (!%p1978_p5) }
 0x3c8   : > { %2777 = vpow2.f32 %v1974_v32  ;;  %v2573_v32 = vpack.c.bf16 (!%p1978_p5), %v1654_v25, %v1653_v22 }
 0x3c9   : > { %2779 = vpow2.f32 %v1975_v39  ;;  %v1640_v39 = vld [vmem:[#allocation12 + $0x28] sm:$0xff] (!%p1978_p5) }
 0x3d2   : > { %v2778_v45 = vpop.eup %2777 }
 0x3d3   : > { %v1254_v47 = vadd.f32 1.0, %v2778_v45  ;;  %v2780_v42 = vpop.eup %2779  ;;  %v2600_v45 = vpack.c.bf16 (!%p1978_p5), %v1640_v39, %v1639_v36 }
 0x3d4   : > { %v1261_v0 = vadd.f32 1.0, %v2780_v42  ;;  %v1656_v42 = vld [vmem:[#allocation13 + $0x28] sm:$0xff] (!%p1978_p5) }
 0x3d5   : > { %2781 = vrcp.f32 %v1254_v47  ;;  %v1655_v47 = vld [vmem:[#allocation13 + $0x20] sm:$0xff] (!%p1978_p5) }
 0x3df   : > { %v2782_v55 = vpop.eup %2781 }
 0x3e0   : > { %v1265_v56 = vmul.f32 %v2782_v55, %v1264_v51  ;;  %v2576_v51 = vpack.c.bf16 (!%p1978_p5), %v1656_v42, %v1655_v47  ;;  %v1641_v55 = vld [vmem:[#allocation12 + $0x30] sm:$0xff] (!%p1978_p5) }
 0x3e2   : > { %v1266_v60 = vadd.f32 %v1265_v56, %v3577_v48  ;;  %v1642_v56 = vld [vmem:[#allocation12 + $0x38] sm:$0xff] (!%p1978_p5) }
 0x3e4   : > { %2783 = vtanh.f32 %v1266_v60  ;;  %v2603_v60 = vpack.c.bf16 (!%p1978_p5), %v1642_v56, %v1641_v55 }
 0x3e5   : > { %2785 = vrcp.f32 %v1261_v0  ;;  %v1657_v0 = vld [vmem:[#allocation13 + $0x30] sm:$0xff] (!%p1978_p5) }
 0x3ee   : > { %v2784_v1 = vpop.eup %2783 }
 0x3ef   : > { %v1268_v5 = vsub.f32 %v1104_v14, %v2784_v1  ;;  %v2786_v11 = vpop.eup %2785  ;;  %v2570_v14 = vpack.c.bf16 (!%p1978_p5), %v1652_v13, %v1651_v9 }
 0x3f1   : > { %v1269_v12 = vmul.f32 %v2786_v11, %v1268_v5  ;;  %v1643_v11 = vld [vmem:[#allocation12 + $0x40] sm:$0xff] (!%p1978_p5) }
 0x3f3   : > { %v1270_v15 = vadd.f32 %v2784_v1, %v1269_v12  ;;  %v1658_v1 = vld [vmem:[#allocation13 + $0x38] sm:$0xff] (!%p1978_p5)  ;;  %v1644_v12 = vld [vmem:[#allocation12 + $0x48] sm:$0xff] (!%p1978_p5) }
 0x3f4   : > { %v2579_v5 = vpack.c.bf16 (!%p1978_p5), %v1658_v1, %v1657_v0 }
 0x3f5   : > { %1336 = vmatmul.mubr.f32.vlgmr.msra.gmra.mrb[6].mxu0 %v1270_v15  ;;  %2251 = vmatmul.mubr.f32.vlgmr.msra.gmra.mrb[10].mxu1 %v1270_v15 }
 0x3f6   : > { %1534 = vmatprep.mubr.f32.mxu0 (!%p1978_p5), %v3089_v57  ;;  %2257 = vmatprep.mubr.msk.f32.mxu1 (!%p1978_p5), %vm3091_vm2, %v3089_v57 }
 0x3f7   : > { %2568 = vmatpush3.bf16.msra.mxu1 (!%p1978_p5), %v2567_v63 }
 0x3f8   : > { %2593 = vmatprep.subr.bf16.mxu1 (!%p1978_p5), %v3090_v58 }
 0x3fa   : > { %2258 = vmatmul.mubr.msk.f32.vlgmr.msra.gmra.mrb[0].mxu1 (!%p1978_p5), %vm519_vm0, %v1979_v2 }
 0x3fb   : > { %2327 = vmatprep.mubr.msk.f32.mxu1 (!%p1978_p5), %vm3091_vm2, %v3089_v57  ;;  %2595 = vmatpush3.bf16.msra.mxu1 (!%p1978_p5), %v2594_v8 }
 0x3fc   : > { %2596 = vmatprep.subr.bf16.mxu1 (!%p1978_p5), %v3090_v58 }
 0x3ff   : > { %2598 = vmatpush3.bf16.msra.mxu1 (!%p1978_p5), %v2597_v17 }
 0x400   : > { %2599 = vmatprep.subr.bf16.mxu1 (!%p1978_p5), %v3090_v58 }
 0x403   : > { %2601 = vmatpush3.bf16.msra.mxu1 (!%p1978_p5), %v2600_v45 }
 0x404   : > { %2602 = vmatprep.subr.bf16.mxu1 (!%p1978_p5), %v3090_v58 }
 0x407   : > { %2604 = vmatpush3.bf16.msra.mxu1 (!%p1978_p5), %v2603_v60 }
 0x408   : > { %2605 = vmatprep.subr.bf16.mxu1 (!%p1978_p5), %v3090_v58 }
 0x4c8   : > { %v1337_v20 = vpop.f32.mrb[6].mxu0  ;;  %v1408_v21 = vpop.f32.mrb[10].mxu1 }
 0x4c9   : > { %v2623_v27 = vadd.f32 %v1337_v20, %v3582_v50  ;;  %v1339_v30 = vpop.f32.mrb[7].mxu0  ;;  %v2252_v40 = vpop.f32.mrb[11].mxu1  ;;  %v1430_v29 = vadd.f32 %v3594_v7, %v1408_v21  ;;  %v1448_v7 = vld [vmem:[#allocation10 + $0x20] sm:$0xff] (!%p1978_p5)  ;;  %v1659_v20 = vld [vmem:[#allocation13 + $0x40] sm:$0xff] (!%p1978_p5)  ;;  %v1660_v21 = vld [vmem:[#allocation13 + $0x48] sm:$0xff] (!%p1978_p5) }
 0x4ca   : > { %v2624_v48 = vadd.f32 %v1339_v30, %v3588_v59  ;;  %v2562_v53 = vpack.c.bf16 (!%p1978_p5), %v1448_v7, %v1445_v46  ;;  %v1645_v30 = vld [vmem:[#allocation12 + $0x50] sm:$0xff] (!%p1978_p5)  ;;  %v1646_v40 = vld [vmem:[#allocation12 + $0x58] sm:$0xff] (!%p1978_p5) }
 0x4cb   : > { %v1976_v18 = vmul.f32 -1.442695, %v2623_v27  ;;  %v2582_v27 = vpack.c.bf16 (!%p1978_p5), %v1660_v21, %v1659_v20  ;;  %v1450_v7 = vld [vmem:[%s3797_s30] sm:$0x7] (!%p1978_p5) }
 0x4cc   : > { %v1977_v19 = vmul.f32 -1.442695, %v2624_v48  ;;  %2563 = vmatprep.subr.bf16.mxu0 (!%p1978_p5), %v2562_v53  ;;  %v1661_v48 = vld [vmem:[#allocation13 + $0x50] sm:$0xff] (!%p1978_p5) }
 0x4cd   : > { %2787 = vpow2.f32 %v1976_v18  ;;  %v2609_v18 = vpack.c.bf16 (!%p1978_p5), %v1646_v40, %v1645_v30 }
 0x4ce   : > { %2789 = vpow2.f32 %v1977_v19  ;;  %v1662_v19 = vld [vmem:[#allocation13 + $0x58] sm:$0xff] (!%p1978_p5) }
 0x4d7   : > { %v2788_v23 = vpop.eup %2787 }
 0x4d8   : > { %v1420_v24 = vadd.f32 1.0, %v2788_v23  ;;  %v2790_v28 = vpop.eup %2789  ;;  %v2585_v23 = vpack.c.bf16 (!%p1978_p5), %v1662_v19, %v1661_v48 }
 0x4d9   : > { %v1427_v37 = vadd.f32 1.0, %v2790_v28  ;;  %v1648_v28 = vld [vmem:[#allocation12 + $0x68] sm:$0xff] (!%p1978_p5) }
 0x4da   : > { %2791 = vrcp.f32 %v1420_v24  ;;  %v1647_v24 = vld [vmem:[#allocation12 + $0x60] sm:$0xff] (!%p1978_p5) }
 0x4e4   : > { %v2792_v31 = vpop.eup %2791 }
 0x4e5   : > { %v1431_v35 = vmul.f32 %v2792_v31, %v1430_v29  ;;  %v1663_v29 = vld [vmem:[#allocation13 + $0x60] sm:$0xff] (!%p1978_p5)  ;;  %v2612_v31 = vpack.c.bf16 (!%p1978_p5), %v1648_v28, %v1647_v24 }
 0x4e7   : > { %v1432_v26 = vadd.f32 %v1431_v35, %v3575_v44  ;;  %v1447_v44 = vld [vmem:[#allocation10 + $0x18] sm:$0xff] (!%p1978_p5) }
 0x4e8   : > { %v2564_v10 = vpack.c.bf16 (!%p1978_p5), %v1447_v44, %v1444_v52  ;;  %v1664_v35 = vld [vmem:[#allocation13 + $0x68] sm:$0xff] (!%p1978_p5)  ;;  %v1455_v52 = vrot.slane (!%p1978_p5), %v1450_v7, %v506_v49  ;;  %v1459_v44 = vrot.slane (!%p1978_p5), %v1450_v7, %v510_v54  ;;  %v1463_v49 = vrot.slane (!%p1978_p5), %v1450_v7, %v514_v34  ;;  %v1984_v54 = vld [vmem:[%s3798_s26] ss:$0 sm:$0xff] (!%p1978_p5) }
 0x4e9   : > { %2793 = vtanh.f32 %v1432_v26  ;;  %v2588_v26 = vpack.c.bf16 (!%p1978_p5), %v1664_v35, %v1663_v29  ;;  %v1985_v34 = vld [vmem:[%s3799_s6] ss:$0 sm:$0xff] (!%p1978_p5) }
 0x4ea   : > { %2795 = vrcp.f32 %v1427_v37  ;;  %2565 = vmatpush1.bf16.msra.mxu0 (!%p1978_p5), %v2564_v10  ;;  %v1649_v37 = vld [vmem:[#allocation12 + $0x70] sm:$0xff] (!%p1978_p5)  ;;  %v1607_v10 = vpop.f32.mrb[0].mxu1 (!%p1978_p5) }
 0x4eb   : > { %2569 = vmatprep.subr.bf16.mxu0 (!%p1978_p5), %v3090_v58  ;;  %v2259_v62 = vpop.f32.mrb[1].mxu1 (!%p1978_p5)  ;;  %v1608_v9 = vadd.f32 (!%p1978_p5), %v1607_v10, %v1463_v49 }
 0x4ed   : > { %1980 = vmatmul.mubr.msk.f32.vlgmr.msra.gmra.mrb[0].mxu0 (!%p1978_p5), %vm519_vm0, %v1979_v2 }
 0x4ee   : > { %2292 = vmatprep.mubr.msk.f32.mxu0 (!%p1978_p5), %vm3091_vm2, %v3089_v57  ;;  %2571 = vmatpush3.bf16.msra.mxu0 (!%p1978_p5), %v2570_v14 }
 0x4ef   : > { %2572 = vmatprep.subr.bf16.mxu0 (!%p1978_p5), %v3090_v58 }
 0x4f2   : > { %2574 = vmatpush3.bf16.msra.mxu0 (!%p1978_p5), %v2573_v32 }
 0x4f3   : > { %v2794_v50 = vpop.eup %2793  ;;  %2575 = vmatprep.subr.bf16.mxu0 (!%p1978_p5), %v3090_v58 }
 0x4f4   : > { %v1434_v38 = vsub.f32 %v1270_v15, %v2794_v50  ;;  %v2796_v41 = vpop.eup %2795  ;;  %1441 = sbr.rel (%p1978_p5) target bundleno = 1761 (0x6e1), region = 96  ;;  %v2606_v15 = vpack.c.bf16 (!%p1978_p5), %v1644_v12, %v1643_v11 }
 0x4f6   : > { %v1435_v43 = vmul.f32 %v2796_v41, %v1434_v38  ;;  %2577 = vmatpush3.bf16.msra.mxu0 (!%p1978_p5), %v2576_v51  ;;  %2607 = vmatpush3.bf16.msra.mxu1 (!%p1978_p5), %v2606_v15  ;;  %v1665_v38 = vld [vmem:[#allocation13 + $0x70] sm:$0xff] (!%p1978_p5)  ;;  %v1666_v41 = vld [vmem:[#allocation13 + $0x78] sm:$0xff] (!%p1978_p5) }
 0x4f7   : > { %2578 = vmatprep.subr.bf16.mxu0 (!%p1978_p5), %v3090_v58  ;;  %2608 = vmatprep.subr.bf16.mxu1 (!%p1978_p5), %v3090_v58  ;;  %v2591_v46 = vpack.c.bf16 (!%p1978_p5), %v1666_v41, %v1665_v38 }
 0x4f8   : > { %v3678_v59 = vadd.f32 %v2794_v50, %v1435_v43  ;;  %v1650_v50 = vld [vmem:[#allocation12 + $0x78] sm:$0xff] (!%p1978_p5) }
 0x4f9   : > { %v2615_v43 = vpack.c.bf16 (!%p1978_p5), %v1650_v50, %v1649_v37 }
 0x4fa   : > { %1437 = vst [vmem:[#allocation2] sm:$0xff] %v3678_v59  ;;  %2580 = vmatpush3.bf16.msra.mxu0 (!%p1978_p5), %v2579_v5  ;;  %2610 = vmatpush3.bf16.msra.mxu1 (!%p1978_p5), %v2609_v18 }
 0x4fb   : > { %2581 = vmatprep.subr.bf16.mxu0 %v3090_v58  ;;  %2611 = vmatprep.subr.bf16.mxu1 %v3090_v58 }
 0x4fe   : > { %2583 = vmatpush3.bf16.msra.mxu0 %v2582_v27  ;;  %2613 = vmatpush3.bf16.msra.mxu1 %v2612_v31 }
 0x4ff   : > { %2584 = vmatprep.subr.bf16.mxu0 %v3090_v58  ;;  %2614 = vmatprep.subr.bf16.mxu1 %v3090_v58 }
 0x502   : > { %2586 = vmatpush3.bf16.msra.mxu0 %v2585_v23  ;;  %2616 = vmatpush3.bf16.msra.mxu1 %v2615_v43 }
 0x503   : > { %2587 = vmatprep.subr.bf16.mxu0 %v3090_v58 }
 0x505   : > { %2328 = vmatmul.mubr.f32.vlgmr.msra.gmra.mrb[2].mxu1 %v3678_v59 }
 0x506   : > { %2589 = vmatpush3.bf16.msra.mxu0 %v2588_v26 }
 0x507   : > { %2590 = vmatprep.subr.bf16.mxu0 %v3090_v58 }
 0x50a   : > { %2592 = vmatpush3.bf16.msra.mxu0 %v2591_v46 }
 0x5c0   : > { %v1536_v53 = vpop.f32.mrb[0].mxu0 }
 0x5c1   : > { %v1537_v57 = vadd.f32 %v1536_v53, %v1455_v52  ;;  %v1538_v61 = vpop.f32.mrb[1].mxu0 }
 0x5c2   : > { %v1539_v63 = vadd.f32 %v1538_v61, %v1459_v44 }
 0x5c3   : > { %v1982_v58 = vmul.f32 -1.442695, %v1537_v57 }
 0x5c4   : > { %v1983_v2 = vmul.f32 -1.442695, %v1539_v63 }
 0x5c5   : > { %2797 = vpow2.f32 %v1982_v58 }
 0x5c6   : > { %2799 = vpow2.f32 %v1983_v2 }
 0x5cf   : > { %v2798_v59 = vpop.eup %2797 }
 0x5d0   : > { %v1614_v3 = vadd.f32 1.0, %v2798_v59  ;;  %v2800_v4 = vpop.eup %2799 }
 0x5d1   : > { %v1620_v8 = vadd.f32 1.0, %v2800_v4 }
 0x5d2   : > { %2801 = vrcp.f32 %v1614_v3 }
 0x5d3   : > { %2803 = vrcp.f32 %v1620_v8 }
 0x5d8   : > { %v1803_v32 = vpop.f32.mrb[2].mxu1 }
 0x5d9   : > { %v2329_v36 = vpop.f32.mrb[3].mxu1 }
 0x5dc   : > { %v2802_v13 = vpop.eup %2801 }
 0x5dd   : > { %v1630_v14 = vmul.f32 %v2802_v13, %v1984_v54  ;;  %v2804_v16 = vpop.eup %2803 }
 0x5de   : > { %v1633_v17 = vsub.f32 1.0, %v2804_v16 }
 0x5df   : > { %v1631_v6 = vadd.f32 %v1630_v14, %v1608_v9 }
 0x5e1   : > { %2805 = vtanh.f32 %v1631_v6 }
 0x5eb   : > { %v2806_v22 = vpop.eup %2805 }
 0x5ec   : > { %v1634_v25 = vmul.f32 %v2806_v22, %v1633_v17 }
 0x5ee   : > { %2293 = vmatmul.mubr.f32.vlgmr.msra.gmra.mrb[2].mxu0 %v1634_v25 }
 0x6c1   : > { %v1733_v33 = vpop.f32.mrb[2].mxu0 }
 0x6c2   : > { %v1804_v39 = vadd.f32 %v1803_v32, %v1733_v33  ;;  %v2294_v45 = vpop.f32.mrb[3].mxu0 }
 0x6c4   : > { %v1814_v47 = vadd.f32 %v1985_v34, %v1804_v39 }
 0x6c6   : > { %v1986_v42 = vmul.f32 -1.442695, %v1814_v47 }
 0x6c8   : > { %2807 = vpow2.f32 %v1986_v42 }
 0x6d2   : > { %v2808_v51 = vpop.eup %2807 }
 0x6d3   : > { %v1818_v55 = vadd.f32 1.0, %v2808_v51 }
 0x6d5   : > { %2809 = vrcp.f32 %v1818_v55 }
 0x6df   : > { %v2810_v56 = vpop.eup %2809 }
 0x6e0   : > { %1821 = vst [vmem:[#allocation15] sm:$0xff] %v2810_v56 }
 0x6e1 PF: > { %s3800_s16 = sadd.s32 4294967295, %s3073_s22   ;;  %s3092_s27 = smov [#allocation15]  }
 0x6e2   : > { %p3720_p11 = scmp.eq.s32.totalorder %s3800_s16, 1  ;;  %s1831_s13 = sshll.u32 %s3092_s27, 4  ;;  %s1832_s13 = int_to_ptr.vmem [resolvable:$true] %s1831_s13 }
 0x6e3   : > { %s2981_s24 = scalar_lea.vmem %s1832_s13, 128  ;;  %p2988_p2 = scmp.lt.s32.totalorder %s1832_s13, %s1832_s13 }
 0x6e4   : > { %p2982_p12 = scmp.ne.s32.totalorder %s1832_s13, %s2981_s24  ;;  %p2989_p6 = scmp.lt.s32.totalorder %s2981_s24, %s2981_s24 }
 0x6e6   : > { %p2983_p13 = pnand %p2982_p12, %p3720_p11  ;;  %p2990_p9 = por %p2989_p6, %p2988_p2 }
 0x6e8   : > { %p2984_p0 = pneg %p2983_p13 }
 0x6ea   : > { %p2991_p7 = pnand %p2990_p9, %p2984_p0 }
 0x6ec   : > { %2994 = shalt.err (!%p2991_p7)
}
 0x6ed   : > { %s3802_s15 = sld [smem:[#allocation25_spill]] }
 0x6f3   : > { %s2995_s10 = scalar_lea.hbm %s3802_s15, 128 }
 0x6f4   : > { %p2996_p1 = scmp.ne.s32.totalorder %s3802_s15, %s2995_s10  ;;  %p3001_p10 = scmp.lt.u32.totalorder %s2995_s10, %s3802_s15 }
 0x6f6   : > { %p2997_p3 = pnand %p2996_p1, %p3720_p11 }
 0x6f8   : > { %p2998_p8 = pneg %p2997_p3 }
 0x6fa   : > { %p3003_p4 = pnand %p3001_p10, %p2998_p8 }
 0x6fc   : > { %3006 = shalt.err (!%p3003_p4)
}
 0x6fd   : > { %2656 = dma.vmem_to_hbm [thread:$0]  (%p3720_p11), %s1832_s13, 128, %s3802_s15, [#allocation6]  }
 0x6fe   : > { %3048 = dma.done.wait (%p3720_p11), [#allocation6], 128  }
 0x6ff   : > { %3050 = vsyncadd (%p3720_p11), [#allocation6], 4294967168 }
 0x700 PF: > { %s28_s22 = sadd.s32 1, %s3073_s22   ;;  %s3803_s17 = smov %s3057_s18 }
 0x701   : > { %p25_p5 = scmp.ge.s32.totalorder %s28_s22, 4   ;;  %s3804_s18 = smov %s3061_s19 }
 0x702   : > { %s3805_s19 = smov %s3357_s12  ;;  %s3806_s20 = smov %s3069_s21 }
 0x703   : > { %s3807_s21 = smov %s3809_s11  ;;  %27 = sbr.rel (!%p25_p5) target bundleno = 14 (0xe), region = 134 }
 0x70a   :  { %1844 = vsyncpa [#allocation5], 1 }
 0x70b   :  { %1846 = vsyncpa [#allocation5 + $0x1], 1 }
 0x70c   :  { %1847 = vsyncpa [#allocation8], 1 }
 0x70d   :  { %1848 = vsyncpa [#allocation11], 1 }
 0x70e   :  { %1849 = vsyncpa [#allocation14], 1 }
 0x70f   :  { %1850 = vsyncpa [#allocation6], 1 }
 0x710   :  { %1852 = vsyncpa [#allocation6 + $0x1], 1 }

</bundles_post_ra>
